<compile_context>
chip_gen: v7x
topology: tpu7x:2x2x1
jax: 0.10.0
libtpu: 0.0.40
codegen_flags: <defaults>
</compile_context>

<pallas_src>
import jax
import jax.numpy as jnp
from jax.experimental import pallas as pl
from jax.experimental.pallas import tpu as pltpu


LANE = 128


def _round_up(x, m):
    return (x + m - 1) // m * m


# ---------------------------------------------------------------------------
# GRU recurrence kernel.  PyTorch gate order [r, z, n]:
#   r  = sig(gi_r + W_hr h)                (b_hr folded into gi on the host)
#   z  = sig(gi_z + W_hz h)                (b_hz folded into gi on the host)
#   n  = tanh(gi_n + r * (W_hn h + b_hn))
#   h' = n + z * (h - n)
# gi = BN(x) @ W_ih^T + b_ih (+ b_hr/b_hz) is precomputed (hoisted) outside.
# ---------------------------------------------------------------------------
def _gru_kernel(gi_ref, whh_ref, bhn_ref, o_ref, h_ref):
    hp = h_ref.shape[-1]           # padded hidden width (lane multiple)
    tc = gi_ref.shape[1]           # timesteps in this chunk (static)

    @pl.when(pl.program_id(1) == 0)      # first time-chunk of this batch block
    def _():
        h_ref[...] = jnp.zeros_like(h_ref)

    bhn = bhn_ref[...]             # (1, Hp): tiny, fine to keep live
    h = h_ref[...]                 # (bb, Hp): carried in vregs, not VMEM

    # Static Python loop => static slice indices on the middle (time) dim;
    # emitted code is equivalent to a fully unrolled fori_loop.
    for i in range(tc):
        gi_t = gi_ref[:, i, :]                           # (bb, 3*Hp)
        whh = whh_ref[...]                               # re-read per step
        gh = jnp.dot(h, whh, preferred_element_type=jnp.float32)
        r = jax.nn.sigmoid(gi_t[:, 0:hp] + gh[:, 0:hp])
        z = jax.nn.sigmoid(gi_t[:, hp:2 * hp] + gh[:, hp:2 * hp])
        n = jnp.tanh(gi_t[:, 2 * hp:3 * hp] + r * (gh[:, 2 * hp:3 * hp] + bhn))
        h = n + z * (h - n)
        o_ref[:, i, :] = h

    h_ref[...] = h                 # single VMEM writeback per chunk


def gru_recurrence(gi, whh_t_pad, bhn, *, time_chunk, batch_block):
    """gi: (B, Tp, 3*Hp) batch-major precomputed input gates.
    Returns (B, Tp, Hp) hidden states."""
    B, Tp, G = gi.shape
    Hp = whh_t_pad.shape[0]
    grid = (B // batch_block, Tp // time_chunk)
    return pl.pallas_call(
        _gru_kernel,
        out_shape=jax.ShapeDtypeStruct((B, Tp, Hp), jnp.float32),
        grid_spec=pltpu.PrefetchScalarGridSpec(
            num_scalar_prefetch=0,
            grid=grid,
            in_specs=[
                pl.BlockSpec((batch_block, time_chunk, G),
                             lambda b, t: (b, t, 0)),
                # Constant-index-map blocks: Pallas does not re-DMA them when
                # the mapped block index is unchanged between grid steps.
                pl.BlockSpec((Hp, G), lambda b, t: (0, 0)),
                pl.BlockSpec((1, Hp), lambda b, t: (0, 0)),
            ],
            out_specs=pl.BlockSpec((batch_block, time_chunk, Hp),
                                   lambda b, t: (b, t, 0)),
            scratch_shapes=[pltpu.VMEM((batch_block, Hp), jnp.float32)],
        ),
        compiler_params=pltpu.CompilerParams(
            dimension_semantics=("parallel", "arbitrary")),
    )(gi, whh_t_pad, bhn)


# ---------------------------------------------------------------------------
# Full BN_GRU forward.
# ---------------------------------------------------------------------------
@jax.jit
def bn_gru_forward(inputs, bn_gamma, bn_beta, w_ih, w_hh, b_ih, b_hh):
    B, C, T, D = inputs.shape                # C == 1
    H = w_hh.shape[1]
    Hp = _round_up(max(H, LANE), LANE)       # lane-dense per-gate width

    # --- BatchNorm2d(1), training-mode batch stats (biased var), as affine ---
    mean = jnp.mean(inputs)
    var = jnp.mean(jnp.square(inputs - mean))
    s = bn_gamma[0] * jax.lax.rsqrt(var + 1e-5)
    t = bn_beta[0] - mean * s

    # --- Pad per-gate width H -> Hp so r/z/n slices are lane-aligned ---------
    def pad_gate_cols(w):                    # (..., 3H) -> (..., 3*Hp), zeros
        w3 = w.reshape(w.shape[:-1] + (3, H))
        w3 = jnp.pad(w3, [(0, 0)] * (w3.ndim - 1) + [(0, Hp - H)])
        return w3.reshape(w.shape[:-1] + (3 * Hp,))

    wih_t = pad_gate_cols(jnp.transpose(w_ih))           # (D, 3*Hp)
    whh_t = pad_gate_cols(jnp.transpose(w_hh))           # (H, 3*Hp)
    whh_t = jnp.pad(whh_t, ((0, Hp - H), (0, 0)))        # (Hp, 3*Hp)
    bih_p = pad_gate_cols(b_ih.reshape(1, 3 * H))        # (1, 3*Hp)
    bhh_p = pad_gate_cols(b_hh.reshape(1, 3 * H))        # (1, 3*Hp)
    bhh_rz = bhh_p.at[:, 2 * Hp:].set(0.0)               # r/z parts (foldable)
    bhn = bhh_p[:, 2 * Hp:]                              # (1, Hp) n-gate bias

    # --- Hoisted input projection (batch-major, no transposes) --------------
    #   gi = s*(x @ W_ih^T) + t*colsum(W_ih^T) + b_ih + [b_hr, b_hz, 0]
    bias_eff = t * jnp.sum(wih_t, axis=0, keepdims=True) + bih_p + bhh_rz
    gi = s * jnp.einsum('btd,dg->btg', inputs[:, 0], wih_t,
                        preferred_element_type=jnp.float32) + bias_eff
    # TODO(synk): on v6e/v7x cast x/W_ih (and the stored gi stream) to bf16 to
    # halve HBM traffic of the projection; kept f32 to match module numerics.

    # --- Chunk timesteps per grid step (pad T if not divisible) -------------
    time_chunk = min(128, _round_up(T, 8))
    Tp = _round_up(T, time_chunk)
    if Tp != T:
        gi = jnp.pad(gi, ((0, 0), (0, Tp - T), (0, 0)))

    # Split the batch into 2 "parallel" blocks only when each block stays
    # sublane-dense (>= 8 rows); lets v7x's second TensorCore take half.
    batch_block = B // 2 if (B >= 16 and B % 16 == 0) else B

    out = gru_recurrence(gi, whh_t, bhn,
                         time_chunk=time_chunk, batch_block=batch_block)

    # Slice off time / hidden padding, add channel dim.  (B, 1, T, H)
    return out[:, :T, :H][:, None]


# ---------------------------------------------------------------------------
# Deterministic parameter init (shapes follow BN_GRU.__init__ / init_weights).
# ---------------------------------------------------------------------------
def init_params(key, input_dim, hidden_dim):
    k_ih, k_hh = jax.random.split(key)
    # weight_ih_l0: (3H, D), xavier_uniform
    bound = (6.0 / (input_dim + 3 * hidden_dim)) ** 0.5
    w_ih = jax.random.uniform(k_ih, (3 * hidden_dim, input_dim),
                              jnp.float32, -bound, bound)
    # weight_hh_l0: (3H, H), orthogonal (orthonormal columns via QR)
    a = jax.random.normal(k_hh, (3 * hidden_dim, hidden_dim), jnp.float32)
    q, r = jnp.linalg.qr(a)
    w_hh = q * jnp.sign(jnp.diag(r))[None, :]
    # biases filled with 0, BatchNorm2d(1): weight=1, bias=0
    b_ih = jnp.zeros((3 * hidden_dim,), jnp.float32)
    b_hh = jnp.zeros((3 * hidden_dim,), jnp.float32)
    bn_gamma = jnp.ones((1,), jnp.float32)
    bn_beta = jnp.zeros((1,), jnp.float32)
    return bn_gamma, bn_beta, w_ih, w_hh, b_ih, b_hh


# ---------------------------------------------------------------------------
# Pure-JAX reference (for correctness check).
# ---------------------------------------------------------------------------
def bn_gru_ref(inputs, bn_gamma, bn_beta, w_ih, w_hh, b_ih, b_hh):
    x = inputs
    mean = jnp.mean(x)
    var = jnp.mean((x - mean) ** 2)
    x = (x - mean) * jax.lax.rsqrt(var + 1e-5) * bn_gamma[0] + bn_beta[0]
    x = x[:, 0]                                          # (B, T, D)
    B, T, D = x.shape
    H = w_hh.shape[1]

    def step(h, x_t):
        gi = x_t @ w_ih.T + b_ih
        gh = h @ w_hh.T + b_hh
        r = jax.nn.sigmoid(gi[:, :H] + gh[:, :H])
        z = jax.nn.sigmoid(gi[:, H:2 * H] + gh[:, H:2 * H])
        n = jnp.tanh(gi[:, 2 * H:] + r * gh[:, 2 * H:])
        h_new = (1.0 - z) * n + z * h
        return h_new, h_new

    h0 = jnp.zeros((B, H), jnp.float32)
    _, ys = jax.lax.scan(step, h0, jnp.transpose(x, (1, 0, 2)))
    return jnp.transpose(ys, (1, 0, 2))[:, None]


if __name__ == "__main__":
    B, T, D, H = 2, 8, 16, 32
    key = jax.random.PRNGKey(0)
    k_in, k_p, k_b1, k_b2 = jax.random.split(key, 4)
    inputs = jax.random.normal(k_in, (B, 1, T, D), jnp.float32)
    bn_gamma, bn_beta, w_ih, w_hh, b_ih, b_hh = init_params(k_p, D, H)
    # Perturb biases / BN affine away from their zero/unit init so the
    # host-side bias-folding paths are actually exercised by the check.
    b_ih = 0.1 * jax.random.normal(k_b1, b_ih.shape, jnp.float32)
    b_hh = 0.1 * jax.random.normal(k_b2, b_hh.shape, jnp.float32)
    bn_gamma = jnp.array([1.3], jnp.float32)
    bn_beta = jnp.array([-0.2], jnp.float32)
    params = (bn_gamma, bn_beta, w_ih, w_hh, b_ih, b_hh)

    out = jax.block_until_ready(bn_gru_forward(inputs, *params))
    ref = bn_gru_ref(inputs, *params)

    assert out.shape == (B, 1, T, H), out.shape
    max_err = float(jnp.max(jnp.abs(out - ref)))
    assert jnp.allclose(out, ref, atol=1e-4, rtol=1e-4), max_err

    print("KERNEL_OK")
</pallas_src>

<mosaic_0001>
module attributes {stable_mosaic.version = 11 : i64} {
  func.func @_gru_kernel(%arg0: i32, %arg1: i32, %arg2: memref<2x8x384xf32, #tpu.memory_space<vmem>>, %arg3: memref<128x384xf32, #tpu.memory_space<vmem>>, %arg4: memref<1x128xf32, #tpu.memory_space<vmem>>, %arg5: memref<2x8x128xf32, #tpu.memory_space<vmem>>, %arg6: memref<2x128xf32, #tpu.memory_space<vmem>>) attributes {dimension_semantics = [#tpu.dimension_semantics<parallel>, #tpu.dimension_semantics<arbitrary>], iteration_bounds = array<i64: 1, 1>, scalar_prefetch = 0 : i64, scratch_operands = 1 : i64, tpu.core_type = #tpu.core_type<tc>, window_params = [{transform_indices = @transform_0, window_bounds = array<i64: 2, 8, 384>}, {pipeline_mode = #tpu.pipeline_mode<synchronous>, transform_indices = @transform_1, window_bounds = array<i64: 128, 384>}, {pipeline_mode = #tpu.pipeline_mode<synchronous>, transform_indices = @transform_2, window_bounds = array<i64: 1, 128>}, {transform_indices = @transform_3, window_bounds = array<i64: 2, 8, 128>}]} {
    %c0_i32 = arith.constant 0 : i32
    %0 = arith.cmpi eq, %arg1, %c0_i32 : i32
    %1 = arith.extui %0 : i1 to i32
    %c0_i32_0 = arith.constant 0 : i32
    %2 = arith.cmpi ne, %1, %c0_i32_0 : i32
    scf.if %2 {
      %cst_86 = arith.constant 0.000000e+00 : f32
      %270 = vector.broadcast %cst_86 : f32 to vector<2x128xf32>
      %c0_87 = arith.constant 0 : index
      %c0_88 = arith.constant 0 : index
      %271 = vector.load %arg6[%c0_87, %c0_88] : memref<2x128xf32, #tpu.memory_space<vmem>>, vector<2x128xf32>
      tpu.vector_store %arg6[%c0_87, %c0_88], %270 {strides = array<i32>} : memref<2x128xf32, #tpu.memory_space<vmem>>, vector<2x128xf32>,
    } else {
    }
    %c0 = arith.constant 0 : index
    %c0_1 = arith.constant 0 : index
    %3 = vector.load %arg4[%c0, %c0_1] : memref<1x128xf32, #tpu.memory_space<vmem>>, vector<1x128xf32>
    %c0_2 = arith.constant 0 : index
    %c0_3 = arith.constant 0 : index
    %4 = vector.load %arg6[%c0_2, %c0_3] : memref<2x128xf32, #tpu.memory_space<vmem>>, vector<2x128xf32>
    %c0_4 = arith.constant 0 : index
    %c0_5 = arith.constant 0 : index
    %c0_6 = arith.constant 0 : index
    %5 = vector.load %arg2[%c0_4, %c0_5, %c0_6] : memref<2x8x384xf32, #tpu.memory_space<vmem>>, vector<2x1x384xf32>
    %6 = vector.shape_cast %5 : vector<2x1x384xf32> to vector<2x384xf32>
    %c0_7 = arith.constant 0 : index
    %c0_8 = arith.constant 0 : index
    %7 = vector.load %arg3[%c0_7, %c0_8] : memref<128x384xf32, #tpu.memory_space<vmem>>, vector<128x384xf32>
    %cst = arith.constant dense<0.000000e+00> : vector<2x384xf32>
    %8 = tpu.matmul %4, %7, %cst {dimension_numbers = #tpu.dot_dimension_numbers<[1], [0], [0], [1], [0, 0, 1, 1], [], []>} : vector<2x128xf32>, vector<128x384xf32>, vector<2x384xf32> -> vector<2x384xf32>
    %9 = vector.extract_strided_slice %6 {offsets = [0, 0], sizes = [2, 128], strides = [1, 1]} : vector<2x384xf32> to vector<2x128xf32>
    %10 = vector.extract_strided_slice %8 {offsets = [0, 0], sizes = [2, 128], strides = [1, 1]} : vector<2x384xf32> to vector<2x128xf32>
    %11 = arith.addf %9, %10 : vector<2x128xf32>
    %12 = arith.negf %11 : vector<2x128xf32>
    %13 = math.exp %12 : vector<2x128xf32>
    %cst_9 = arith.constant 1.000000e+00 : f32
    %14 = vector.broadcast %cst_9 : f32 to vector<2x128xf32>
    %15 = arith.addf %14, %13 : vector<2x128xf32>
    %16 = arith.divf %14, %15 : vector<2x128xf32>
    %17 = vector.extract_strided_slice %6 {offsets = [0, 128], sizes = [2, 128], strides = [1, 1]} : vector<2x384xf32> to vector<2x128xf32>
    %18 = vector.extract_strided_slice %8 {offsets = [0, 128], sizes = [2, 128], strides = [1, 1]} : vector<2x384xf32> to vector<2x128xf32>
    %19 = arith.addf %17, %18 : vector<2x128xf32>
    %20 = arith.negf %19 : vector<2x128xf32>
    %21 = math.exp %20 : vector<2x128xf32>
    %cst_10 = arith.constant 1.000000e+00 : f32
    %22 = vector.broadcast %cst_10 : f32 to vector<2x128xf32>
    %23 = arith.addf %22, %21 : vector<2x128xf32>
    %24 = arith.divf %22, %23 : vector<2x128xf32>
    %25 = vector.extract_strided_slice %6 {offsets = [0, 256], sizes = [2, 128], strides = [1, 1]} : vector<2x384xf32> to vector<2x128xf32>
    %26 = vector.extract_strided_slice %8 {offsets = [0, 256], sizes = [2, 128], strides = [1, 1]} : vector<2x384xf32> to vector<2x128xf32>
    %27 = vector.broadcast %3 : vector<1x128xf32> to vector<2x128xf32>
    %28 = arith.addf %26, %27 : vector<2x128xf32>
    %29 = arith.mulf %16, %28 : vector<2x128xf32>
    %30 = arith.addf %25, %29 : vector<2x128xf32>
    %31 = math.tanh %30 : vector<2x128xf32>
    %32 = arith.subf %4, %31 : vector<2x128xf32>
    %33 = arith.mulf %24, %32 : vector<2x128xf32>
    %34 = arith.addf %31, %33 : vector<2x128xf32>
    %c0_11 = arith.constant 0 : index
    %c0_12 = arith.constant 0 : index
    %c0_13 = arith.constant 0 : index
    %35 = vector.load %arg5[%c0_11, %c0_12, %c0_13] : memref<2x8x128xf32, #tpu.memory_space<vmem>>, vector<2x1x128xf32>
    %36 = vector.shape_cast %35 : vector<2x1x128xf32> to vector<2x128xf32>
    %37 = vector.shape_cast %34 : vector<2x128xf32> to vector<2x1x128xf32>
    tpu.vector_store %arg5[%c0_11, %c0_12, %c0_13], %37 {strides = array<i32>} : memref<2x8x128xf32, #tpu.memory_space<vmem>>, vector<2x1x128xf32>,
    %c0_14 = arith.constant 0 : index
    %c1 = arith.constant 1 : index
    %c0_15 = arith.constant 0 : index
    %38 = vector.load %arg2[%c0_14, %c1, %c0_15] : memref<2x8x384xf32, #tpu.memory_space<vmem>>, vector<2x1x384xf32>
    %39 = vector.shape_cast %38 : vector<2x1x384xf32> to vector<2x384xf32>
    %c0_16 = arith.constant 0 : index
    %c0_17 = arith.constant 0 : index
    %40 = vector.load %arg3[%c0_16, %c0_17] : memref<128x384xf32, #tpu.memory_space<vmem>>, vector<128x384xf32>
    %cst_18 = arith.constant dense<0.000000e+00> : vector<2x384xf32>
    %41 = tpu.matmul %34, %40, %cst_18 {dimension_numbers = #tpu.dot_dimension_numbers<[1], [0], [0], [1], [0, 0, 1, 1], [], []>} : vector<2x128xf32>, vector<128x384xf32>, vector<2x384xf32> -> vector<2x384xf32>
    %42 = vector.extract_strided_slice %39 {offsets = [0, 0], sizes = [2, 128], strides = [1, 1]} : vector<2x384xf32> to vector<2x128xf32>
    %43 = vector.extract_strided_slice %41 {offsets = [0, 0], sizes = [2, 128], strides = [1, 1]} : vector<2x384xf32> to vector<2x128xf32>
    %44 = arith.addf %42, %43 : vector<2x128xf32>
    %45 = arith.negf %44 : vector<2x128xf32>
    %46 = math.exp %45 : vector<2x128xf32>
    %cst_19 = arith.constant 1.000000e+00 : f32
    %47 = vector.broadcast %cst_19 : f32 to vector<2x128xf32>
    %48 = arith.addf %47, %46 : vector<2x128xf32>
    %49 = arith.divf %47, %48 : vector<2x128xf32>
    %50 = vector.extract_strided_slice %39 {offsets = [0, 128], sizes = [2, 128], strides = [1, 1]} : vector<2x384xf32> to vector<2x128xf32>
    %51 = vector.extract_strided_slice %41 {offsets = [0, 128], sizes = [2, 128], strides = [1, 1]} : vector<2x384xf32> to vector<2x128xf32>
    %52 = arith.addf %50, %51 : vector<2x128xf32>
    %53 = arith.negf %52 : vector<2x128xf32>
    %54 = math.exp %53 : vector<2x128xf32>
    %cst_20 = arith.constant 1.000000e+00 : f32
    %55 = vector.broadcast %cst_20 : f32 to vector<2x128xf32>
    %56 = arith.addf %55, %54 : vector<2x128xf32>
    %57 = arith.divf %55, %56 : vector<2x128xf32>
    %58 = vector.extract_strided_slice %39 {offsets = [0, 256], sizes = [2, 128], strides = [1, 1]} : vector<2x384xf32> to vector<2x128xf32>
    %59 = vector.extract_strided_slice %41 {offsets = [0, 256], sizes = [2, 128], strides = [1, 1]} : vector<2x384xf32> to vector<2x128xf32>
    %60 = vector.broadcast %3 : vector<1x128xf32> to vector<2x128xf32>
    %61 = arith.addf %59, %60 : vector<2x128xf32>
    %62 = arith.mulf %49, %61 : vector<2x128xf32>
    %63 = arith.addf %58, %62 : vector<2x128xf32>
    %64 = math.tanh %63 : vector<2x128xf32>
    %65 = arith.subf %34, %64 : vector<2x128xf32>
    %66 = arith.mulf %57, %65 : vector<2x128xf32>
    %67 = arith.addf %64, %66 : vector<2x128xf32>
    %c0_21 = arith.constant 0 : index
    %c1_22 = arith.constant 1 : index
    %c0_23 = arith.constant 0 : index
    %68 = vector.load %arg5[%c0_21, %c1_22, %c0_23] : memref<2x8x128xf32, #tpu.memory_space<vmem>>, vector<2x1x128xf32>
    %69 = vector.shape_cast %68 : vector<2x1x128xf32> to vector<2x128xf32>
    %70 = vector.shape_cast %67 : vector<2x128xf32> to vector<2x1x128xf32>
    tpu.vector_store %arg5[%c0_21, %c1_22, %c0_23], %70 {strides = array<i32>} : memref<2x8x128xf32, #tpu.memory_space<vmem>>, vector<2x1x128xf32>,
    %c0_24 = arith.constant 0 : index
    %c2 = arith.constant 2 : index
    %c0_25 = arith.constant 0 : index
    %71 = vector.load %arg2[%c0_24, %c2, %c0_25] : memref<2x8x384xf32, #tpu.memory_space<vmem>>, vector<2x1x384xf32>
    %72 = vector.shape_cast %71 : vector<2x1x384xf32> to vector<2x384xf32>
    %c0_26 = arith.constant 0 : index
    %c0_27 = arith.constant 0 : index
    %73 = vector.load %arg3[%c0_26, %c0_27] : memref<128x384xf32, #tpu.memory_space<vmem>>, vector<128x384xf32>
    %cst_28 = arith.constant dense<0.000000e+00> : vector<2x384xf32>
    %74 = tpu.matmul %67, %73, %cst_28 {dimension_numbers = #tpu.dot_dimension_numbers<[1], [0], [0], [1], [0, 0, 1, 1], [], []>} : vector<2x128xf32>, vector<128x384xf32>, vector<2x384xf32> -> vector<2x384xf32>
    %75 = vector.extract_strided_slice %72 {offsets = [0, 0], sizes = [2, 128], strides = [1, 1]} : vector<2x384xf32> to vector<2x128xf32>
    %76 = vector.extract_strided_slice %74 {offsets = [0, 0], sizes = [2, 128], strides = [1, 1]} : vector<2x384xf32> to vector<2x128xf32>
    %77 = arith.addf %75, %76 : vector<2x128xf32>
    %78 = arith.negf %77 : vector<2x128xf32>
    %79 = math.exp %78 : vector<2x128xf32>
    %cst_29 = arith.constant 1.000000e+00 : f32
    %80 = vector.broadcast %cst_29 : f32 to vector<2x128xf32>
    %81 = arith.addf %80, %79 : vector<2x128xf32>
    %82 = arith.divf %80, %81 : vector<2x128xf32>
    %83 = vector.extract_strided_slice %72 {offsets = [0, 128], sizes = [2, 128], strides = [1, 1]} : vector<2x384xf32> to vector<2x128xf32>
    %84 = vector.extract_strided_slice %74 {offsets = [0, 128], sizes = [2, 128], strides = [1, 1]} : vector<2x384xf32> to vector<2x128xf32>
    %85 = arith.addf %83, %84 : vector<2x128xf32>
    %86 = arith.negf %85 : vector<2x128xf32>
    %87 = math.exp %86 : vector<2x128xf32>
    %cst_30 = arith.constant 1.000000e+00 : f32
    %88 = vector.broadcast %cst_30 : f32 to vector<2x128xf32>
    %89 = arith.addf %88, %87 : vector<2x128xf32>
    %90 = arith.divf %88, %89 : vector<2x128xf32>
    %91 = vector.extract_strided_slice %72 {offsets = [0, 256], sizes = [2, 128], strides = [1, 1]} : vector<2x384xf32> to vector<2x128xf32>
    %92 = vector.extract_strided_slice %74 {offsets = [0, 256], sizes = [2, 128], strides = [1, 1]} : vector<2x384xf32> to vector<2x128xf32>
    %93 = vector.broadcast %3 : vector<1x128xf32> to vector<2x128xf32>
    %94 = arith.addf %92, %93 : vector<2x128xf32>
    %95 = arith.mulf %82, %94 : vector<2x128xf32>
    %96 = arith.addf %91, %95 : vector<2x128xf32>
    %97 = math.tanh %96 : vector<2x128xf32>
    %98 = arith.subf %67, %97 : vector<2x128xf32>
    %99 = arith.mulf %90, %98 : vector<2x128xf32>
    %100 = arith.addf %97, %99 : vector<2x128xf32>
    %c0_31 = arith.constant 0 : index
    %c2_32 = arith.constant 2 : index
    %c0_33 = arith.constant 0 : index
    %101 = vector.load %arg5[%c0_31, %c2_32, %c0_33] : memref<2x8x128xf32, #tpu.memory_space<vmem>>, vector<2x1x128xf32>
    %102 = vector.shape_cast %101 : vector<2x1x128xf32> to vector<2x128xf32>
    %103 = vector.shape_cast %100 : vector<2x128xf32> to vector<2x1x128xf32>
    tpu.vector_store %arg5[%c0_31, %c2_32, %c0_33], %103 {strides = array<i32>} : memref<2x8x128xf32, #tpu.memory_space<vmem>>, vector<2x1x128xf32>,
    %c0_34 = arith.constant 0 : index
    %c3 = arith.constant 3 : index
    %c0_35 = arith.constant 0 : index
    %104 = vector.load %arg2[%c0_34, %c3, %c0_35] : memref<2x8x384xf32, #tpu.memory_space<vmem>>, vector<2x1x384xf32>
    %105 = vector.shape_cast %104 : vector<2x1x384xf32> to vector<2x384xf32>
    %c0_36 = arith.constant 0 : index
    %c0_37 = arith.constant 0 : index
    %106 = vector.load %arg3[%c0_36, %c0_37] : memref<128x384xf32, #tpu.memory_space<vmem>>, vector<128x384xf32>
    %cst_38 = arith.constant dense<0.000000e+00> : vector<2x384xf32>
    %107 = tpu.matmul %100, %106, %cst_38 {dimension_numbers = #tpu.dot_dimension_numbers<[1], [0], [0], [1], [0, 0, 1, 1], [], []>} : vector<2x128xf32>, vector<128x384xf32>, vector<2x384xf32> -> vector<2x384xf32>
    %108 = vector.extract_strided_slice %105 {offsets = [0, 0], sizes = [2, 128], strides = [1, 1]} : vector<2x384xf32> to vector<2x128xf32>
    %109 = vector.extract_strided_slice %107 {offsets = [0, 0], sizes = [2, 128], strides = [1, 1]} : vector<2x384xf32> to vector<2x128xf32>
    %110 = arith.addf %108, %109 : vector<2x128xf32>
    %111 = arith.negf %110 : vector<2x128xf32>
    %112 = math.exp %111 : vector<2x128xf32>
    %cst_39 = arith.constant 1.000000e+00 : f32
    %113 = vector.broadcast %cst_39 : f32 to vector<2x128xf32>
    %114 = arith.addf %113, %112 : vector<2x128xf32>
    %115 = arith.divf %113, %114 : vector<2x128xf32>
    %116 = vector.extract_strided_slice %105 {offsets = [0, 128], sizes = [2, 128], strides = [1, 1]} : vector<2x384xf32> to vector<2x128xf32>
    %117 = vector.extract_strided_slice %107 {offsets = [0, 128], sizes = [2, 128], strides = [1, 1]} : vector<2x384xf32> to vector<2x128xf32>
    %118 = arith.addf %116, %117 : vector<2x128xf32>
    %119 = arith.negf %118 : vector<2x128xf32>
    %120 = math.exp %119 : vector<2x128xf32>
    %cst_40 = arith.constant 1.000000e+00 : f32
    %121 = vector.broadcast %cst_40 : f32 to vector<2x128xf32>
    %122 = arith.addf %121, %120 : vector<2x128xf32>
    %123 = arith.divf %121, %122 : vector<2x128xf32>
    %124 = vector.extract_strided_slice %105 {offsets = [0, 256], sizes = [2, 128], strides = [1, 1]} : vector<2x384xf32> to vector<2x128xf32>
    %125 = vector.extract_strided_slice %107 {offsets = [0, 256], sizes = [2, 128], strides = [1, 1]} : vector<2x384xf32> to vector<2x128xf32>
    %126 = vector.broadcast %3 : vector<1x128xf32> to vector<2x128xf32>
    %127 = arith.addf %125, %126 : vector<2x128xf32>
    %128 = arith.mulf %115, %127 : vector<2x128xf32>
    %129 = arith.addf %124, %128 : vector<2x128xf32>
    %130 = math.tanh %129 : vector<2x128xf32>
    %131 = arith.subf %100, %130 : vector<2x128xf32>
    %132 = arith.mulf %123, %131 : vector<2x128xf32>
    %133 = arith.addf %130, %132 : vector<2x128xf32>
    %c0_41 = arith.constant 0 : index
    %c3_42 = arith.constant 3 : index
    %c0_43 = arith.constant 0 : index
    %134 = vector.load %arg5[%c0_41, %c3_42, %c0_43] : memref<2x8x128xf32, #tpu.memory_space<vmem>>, vector<2x1x128xf32>
    %135 = vector.shape_cast %134 : vector<2x1x128xf32> to vector<2x128xf32>
    %136 = vector.shape_cast %133 : vector<2x128xf32> to vector<2x1x128xf32>
    tpu.vector_store %arg5[%c0_41, %c3_42, %c0_43], %136 {strides = array<i32>} : memref<2x8x128xf32, #tpu.memory_space<vmem>>, vector<2x1x128xf32>,
    %c0_44 = arith.constant 0 : index
    %c4 = arith.constant 4 : index
    %c0_45 = arith.constant 0 : index
    %137 = vector.load %arg2[%c0_44, %c4, %c0_45] : memref<2x8x384xf32, #tpu.memory_space<vmem>>, vector<2x1x384xf32>
    %138 = vector.shape_cast %137 : vector<2x1x384xf32> to vector<2x384xf32>
    %c0_46 = arith.constant 0 : index
    %c0_47 = arith.constant 0 : index
    %139 = vector.load %arg3[%c0_46, %c0_47] : memref<128x384xf32, #tpu.memory_space<vmem>>, vector<128x384xf32>
    %cst_48 = arith.constant dense<0.000000e+00> : vector<2x384xf32>
    %140 = tpu.matmul %133, %139, %cst_48 {dimension_numbers = #tpu.dot_dimension_numbers<[1], [0], [0], [1], [0, 0, 1, 1], [], []>} : vector<2x128xf32>, vector<128x384xf32>, vector<2x384xf32> -> vector<2x384xf32>
    %141 = vector.extract_strided_slice %138 {offsets = [0, 0], sizes = [2, 128], strides = [1, 1]} : vector<2x384xf32> to vector<2x128xf32>
    %142 = vector.extract_strided_slice %140 {offsets = [0, 0], sizes = [2, 128], strides = [1, 1]} : vector<2x384xf32> to vector<2x128xf32>
    %143 = arith.addf %141, %142 : vector<2x128xf32>
    %144 = arith.negf %143 : vector<2x128xf32>
    %145 = math.exp %144 : vector<2x128xf32>
    %cst_49 = arith.constant 1.000000e+00 : f32
    %146 = vector.broadcast %cst_49 : f32 to vector<2x128xf32>
    %147 = arith.addf %146, %145 : vector<2x128xf32>
    %148 = arith.divf %146, %147 : vector<2x128xf32>
    %149 = vector.extract_strided_slice %138 {offsets = [0, 128], sizes = [2, 128], strides = [1, 1]} : vector<2x384xf32> to vector<2x128xf32>
    %150 = vector.extract_strided_slice %140 {offsets = [0, 128], sizes = [2, 128], strides = [1, 1]} : vector<2x384xf32> to vector<2x128xf32>
    %151 = arith.addf %149, %150 : vector<2x128xf32>
    %152 = arith.negf %151 : vector<2x128xf32>
    %153 = math.exp %152 : vector<2x128xf32>
    %cst_50 = arith.constant 1.000000e+00 : f32
    %154 = vector.broadcast %cst_50 : f32 to vector<2x128xf32>
    %155 = arith.addf %154, %153 : vector<2x128xf32>
    %156 = arith.divf %154, %155 : vector<2x128xf32>
    %157 = vector.extract_strided_slice %138 {offsets = [0, 256], sizes = [2, 128], strides = [1, 1]} : vector<2x384xf32> to vector<2x128xf32>
    %158 = vector.extract_strided_slice %140 {offsets = [0, 256], sizes = [2, 128], strides = [1, 1]} : vector<2x384xf32> to vector<2x128xf32>
    %159 = vector.broadcast %3 : vector<1x128xf32> to vector<2x128xf32>
    %160 = arith.addf %158, %159 : vector<2x128xf32>
    %161 = arith.mulf %148, %160 : vector<2x128xf32>
    %162 = arith.addf %157, %161 : vector<2x128xf32>
    %163 = math.tanh %162 : vector<2x128xf32>
    %164 = arith.subf %133, %163 : vector<2x128xf32>
    %165 = arith.mulf %156, %164 : vector<2x128xf32>
    %166 = arith.addf %163, %165 : vector<2x128xf32>
    %c0_51 = arith.constant 0 : index
    %c4_52 = arith.constant 4 : index
    %c0_53 = arith.constant 0 : index
    %167 = vector.load %arg5[%c0_51, %c4_52, %c0_53] : memref<2x8x128xf32, #tpu.memory_space<vmem>>, vector<2x1x128xf32>
    %168 = vector.shape_cast %167 : vector<2x1x128xf32> to vector<2x128xf32>
    %169 = vector.shape_cast %166 : vector<2x128xf32> to vector<2x1x128xf32>
    tpu.vector_store %arg5[%c0_51, %c4_52, %c0_53], %169 {strides = array<i32>} : memref<2x8x128xf32, #tpu.memory_space<vmem>>, vector<2x1x128xf32>,
    %c0_54 = arith.constant 0 : index
    %c5 = arith.constant 5 : index
    %c0_55 = arith.constant 0 : index
    %170 = vector.load %arg2[%c0_54, %c5, %c0_55] : memref<2x8x384xf32, #tpu.memory_space<vmem>>, vector<2x1x384xf32>
    %171 = vector.shape_cast %170 : vector<2x1x384xf32> to vector<2x384xf32>
    %c0_56 = arith.constant 0 : index
    %c0_57 = arith.constant 0 : index
    %172 = vector.load %arg3[%c0_56, %c0_57] : memref<128x384xf32, #tpu.memory_space<vmem>>, vector<128x384xf32>
    %cst_58 = arith.constant dense<0.000000e+00> : vector<2x384xf32>
    %173 = tpu.matmul %166, %172, %cst_58 {dimension_numbers = #tpu.dot_dimension_numbers<[1], [0], [0], [1], [0, 0, 1, 1], [], []>} : vector<2x128xf32>, vector<128x384xf32>, vector<2x384xf32> -> vector<2x384xf32>
    %174 = vector.extract_strided_slice %171 {offsets = [0, 0], sizes = [2, 128], strides = [1, 1]} : vector<2x384xf32> to vector<2x128xf32>
    %175 = vector.extract_strided_slice %173 {offsets = [0, 0], sizes = [2, 128], strides = [1, 1]} : vector<2x384xf32> to vector<2x128xf32>
    %176 = arith.addf %174, %175 : vector<2x128xf32>
    %177 = arith.negf %176 : vector<2x128xf32>
    %178 = math.exp %177 : vector<2x128xf32>
    %cst_59 = arith.constant 1.000000e+00 : f32
    %179 = vector.broadcast %cst_59 : f32 to vector<2x128xf32>
    %180 = arith.addf %179, %178 : vector<2x128xf32>
    %181 = arith.divf %179, %180 : vector<2x128xf32>
    %182 = vector.extract_strided_slice %171 {offsets = [0, 128], sizes = [2, 128], strides = [1, 1]} : vector<2x384xf32> to vector<2x128xf32>
    %183 = vector.extract_strided_slice %173 {offsets = [0, 128], sizes = [2, 128], strides = [1, 1]} : vector<2x384xf32> to vector<2x128xf32>
    %184 = arith.addf %182, %183 : vector<2x128xf32>
    %185 = arith.negf %184 : vector<2x128xf32>
    %186 = math.exp %185 : vector<2x128xf32>
    %cst_60 = arith.constant 1.000000e+00 : f32
    %187 = vector.broadcast %cst_60 : f32 to vector<2x128xf32>
    %188 = arith.addf %187, %186 : vector<2x128xf32>
    %189 = arith.divf %187, %188 : vector<2x128xf32>
    %190 = vector.extract_strided_slice %171 {offsets = [0, 256], sizes = [2, 128], strides = [1, 1]} : vector<2x384xf32> to vector<2x128xf32>
    %191 = vector.extract_strided_slice %173 {offsets = [0, 256], sizes = [2, 128], strides = [1, 1]} : vector<2x384xf32> to vector<2x128xf32>
    %192 = vector.broadcast %3 : vector<1x128xf32> to vector<2x128xf32>
    %193 = arith.addf %191, %192 : vector<2x128xf32>
    %194 = arith.mulf %181, %193 : vector<2x128xf32>
    %195 = arith.addf %190, %194 : vector<2x128xf32>
    %196 = math.tanh %195 : vector<2x128xf32>
    %197 = arith.subf %166, %196 : vector<2x128xf32>
    %198 = arith.mulf %189, %197 : vector<2x128xf32>
    %199 = arith.addf %196, %198 : vector<2x128xf32>
    %c0_61 = arith.constant 0 : index
    %c5_62 = arith.constant 5 : index
    %c0_63 = arith.constant 0 : index
    %200 = vector.load %arg5[%c0_61, %c5_62, %c0_63] : memref<2x8x128xf32, #tpu.memory_space<vmem>>, vector<2x1x128xf32>
    %201 = vector.shape_cast %200 : vector<2x1x128xf32> to vector<2x128xf32>
    %202 = vector.shape_cast %199 : vector<2x128xf32> to vector<2x1x128xf32>
    tpu.vector_store %arg5[%c0_61, %c5_62, %c0_63], %202 {strides = array<i32>} : memref<2x8x128xf32, #tpu.memory_space<vmem>>, vector<2x1x128xf32>,
    %c0_64 = arith.constant 0 : index
    %c6 = arith.constant 6 : index
    %c0_65 = arith.constant 0 : index
    %203 = vector.load %arg2[%c0_64, %c6, %c0_65] : memref<2x8x384xf32, #tpu.memory_space<vmem>>, vector<2x1x384xf32>
    %204 = vector.shape_cast %203 : vector<2x1x384xf32> to vector<2x384xf32>
    %c0_66 = arith.constant 0 : index
    %c0_67 = arith.constant 0 : index
    %205 = vector.load %arg3[%c0_66, %c0_67] : memref<128x384xf32, #tpu.memory_space<vmem>>, vector<128x384xf32>
    %cst_68 = arith.constant dense<0.000000e+00> : vector<2x384xf32>
    %206 = tpu.matmul %199, %205, %cst_68 {dimension_numbers = #tpu.dot_dimension_numbers<[1], [0], [0], [1], [0, 0, 1, 1], [], []>} : vector<2x128xf32>, vector<128x384xf32>, vector<2x384xf32> -> vector<2x384xf32>
    %207 = vector.extract_strided_slice %204 {offsets = [0, 0], sizes = [2, 128], strides = [1, 1]} : vector<2x384xf32> to vector<2x128xf32>
    %208 = vector.extract_strided_slice %206 {offsets = [0, 0], sizes = [2, 128], strides = [1, 1]} : vector<2x384xf32> to vector<2x128xf32>
    %209 = arith.addf %207, %208 : vector<2x128xf32>
    %210 = arith.negf %209 : vector<2x128xf32>
    %211 = math.exp %210 : vector<2x128xf32>
    %cst_69 = arith.constant 1.000000e+00 : f32
    %212 = vector.broadcast %cst_69 : f32 to vector<2x128xf32>
    %213 = arith.addf %212, %211 : vector<2x128xf32>
    %214 = arith.divf %212, %213 : vector<2x128xf32>
    %215 = vector.extract_strided_slice %204 {offsets = [0, 128], sizes = [2, 128], strides = [1, 1]} : vector<2x384xf32> to vector<2x128xf32>
    %216 = vector.extract_strided_slice %206 {offsets = [0, 128], sizes = [2, 128], strides = [1, 1]} : vector<2x384xf32> to vector<2x128xf32>
    %217 = arith.addf %215, %216 : vector<2x128xf32>
    %218 = arith.negf %217 : vector<2x128xf32>
    %219 = math.exp %218 : vector<2x128xf32>
    %cst_70 = arith.constant 1.000000e+00 : f32
    %220 = vector.broadcast %cst_70 : f32 to vector<2x128xf32>
    %221 = arith.addf %220, %219 : vector<2x128xf32>
    %222 = arith.divf %220, %221 : vector<2x128xf32>
    %223 = vector.extract_strided_slice %204 {offsets = [0, 256], sizes = [2, 128], strides = [1, 1]} : vector<2x384xf32> to vector<2x128xf32>
    %224 = vector.extract_strided_slice %206 {offsets = [0, 256], sizes = [2, 128], strides = [1, 1]} : vector<2x384xf32> to vector<2x128xf32>
    %225 = vector.broadcast %3 : vector<1x128xf32> to vector<2x128xf32>
    %226 = arith.addf %224, %225 : vector<2x128xf32>
    %227 = arith.mulf %214, %226 : vector<2x128xf32>
    %228 = arith.addf %223, %227 : vector<2x128xf32>
    %229 = math.tanh %228 : vector<2x128xf32>
    %230 = arith.subf %199, %229 : vector<2x128xf32>
    %231 = arith.mulf %222, %230 : vector<2x128xf32>
    %232 = arith.addf %229, %231 : vector<2x128xf32>
    %c0_71 = arith.constant 0 : index
    %c6_72 = arith.constant 6 : index
    %c0_73 = arith.constant 0 : index
    %233 = vector.load %arg5[%c0_71, %c6_72, %c0_73] : memref<2x8x128xf32, #tpu.memory_space<vmem>>, vector<2x1x128xf32>
    %234 = vector.shape_cast %233 : vector<2x1x128xf32> to vector<2x128xf32>
    %235 = vector.shape_cast %232 : vector<2x128xf32> to vector<2x1x128xf32>
    tpu.vector_store %arg5[%c0_71, %c6_72, %c0_73], %235 {strides = array<i32>} : memref<2x8x128xf32, #tpu.memory_space<vmem>>, vector<2x1x128xf32>,
    %c0_74 = arith.constant 0 : index
    %c7 = arith.constant 7 : index
    %c0_75 = arith.constant 0 : index
    %236 = vector.load %arg2[%c0_74, %c7, %c0_75] : memref<2x8x384xf32, #tpu.memory_space<vmem>>, vector<2x1x384xf32>
    %237 = vector.shape_cast %236 : vector<2x1x384xf32> to vector<2x384xf32>
    %c0_76 = arith.constant 0 : index
    %c0_77 = arith.constant 0 : index
    %238 = vector.load %arg3[%c0_76, %c0_77] : memref<128x384xf32, #tpu.memory_space<vmem>>, vector<128x384xf32>
    %cst_78 = arith.constant dense<0.000000e+00> : vector<2x384xf32>
    %239 = tpu.matmul %232, %238, %cst_78 {dimension_numbers = #tpu.dot_dimension_numbers<[1], [0], [0], [1], [0, 0, 1, 1], [], []>} : vector<2x128xf32>, vector<128x384xf32>, vector<2x384xf32> -> vector<2x384xf32>
    %240 = vector.extract_strided_slice %237 {offsets = [0, 0], sizes = [2, 128], strides = [1, 1]} : vector<2x384xf32> to vector<2x128xf32>
    %241 = vector.extract_strided_slice %239 {offsets = [0, 0], sizes = [2, 128], strides = [1, 1]} : vector<2x384xf32> to vector<2x128xf32>
    %242 = arith.addf %240, %241 : vector<2x128xf32>
    %243 = arith.negf %242 : vector<2x128xf32>
    %244 = math.exp %243 : vector<2x128xf32>
    %cst_79 = arith.constant 1.000000e+00 : f32
    %245 = vector.broadcast %cst_79 : f32 to vector<2x128xf32>
    %246 = arith.addf %245, %244 : vector<2x128xf32>
    %247 = arith.divf %245, %246 : vector<2x128xf32>
    %248 = vector.extract_strided_slice %237 {offsets = [0, 128], sizes = [2, 128], strides = [1, 1]} : vector<2x384xf32> to vector<2x128xf32>
    %249 = vector.extract_strided_slice %239 {offsets = [0, 128], sizes = [2, 128], strides = [1, 1]} : vector<2x384xf32> to vector<2x128xf32>
    %250 = arith.addf %248, %249 : vector<2x128xf32>
    %251 = arith.negf %250 : vector<2x128xf32>
    %252 = math.exp %251 : vector<2x128xf32>
    %cst_80 = arith.constant 1.000000e+00 : f32
    %253 = vector.broadcast %cst_80 : f32 to vector<2x128xf32>
    %254 = arith.addf %253, %252 : vector<2x128xf32>
    %255 = arith.divf %253, %254 : vector<2x128xf32>
    %256 = vector.extract_strided_slice %237 {offsets = [0, 256], sizes = [2, 128], strides = [1, 1]} : vector<2x384xf32> to vector<2x128xf32>
    %257 = vector.extract_strided_slice %239 {offsets = [0, 256], sizes = [2, 128], strides = [1, 1]} : vector<2x384xf32> to vector<2x128xf32>
    %258 = vector.broadcast %3 : vector<1x128xf32> to vector<2x128xf32>
    %259 = arith.addf %257, %258 : vector<2x128xf32>
    %260 = arith.mulf %247, %259 : vector<2x128xf32>
    %261 = arith.addf %256, %260 : vector<2x128xf32>
    %262 = math.tanh %261 : vector<2x128xf32>
    %263 = arith.subf %232, %262 : vector<2x128xf32>
    %264 = arith.mulf %255, %263 : vector<2x128xf32>
    %265 = arith.addf %262, %264 : vector<2x128xf32>
    %c0_81 = arith.constant 0 : index
    %c7_82 = arith.constant 7 : index
    %c0_83 = arith.constant 0 : index
    %266 = vector.load %arg5[%c0_81, %c7_82, %c0_83] : memref<2x8x128xf32, #tpu.memory_space<vmem>>, vector<2x1x128xf32>
    %267 = vector.shape_cast %266 : vector<2x1x128xf32> to vector<2x128xf32>
    %268 = vector.shape_cast %265 : vector<2x128xf32> to vector<2x1x128xf32>
    tpu.vector_store %arg5[%c0_81, %c7_82, %c0_83], %268 {strides = array<i32>} : memref<2x8x128xf32, #tpu.memory_space<vmem>>, vector<2x1x128xf32>,
    %c0_84 = arith.constant 0 : index
    %c0_85 = arith.constant 0 : index
    %269 = vector.load %arg6[%c0_84, %c0_85] : memref<2x128xf32, #tpu.memory_space<vmem>>, vector<2x128xf32>
    tpu.vector_store %arg6[%c0_84, %c0_85], %265 {strides = array<i32>} : memref<2x128xf32, #tpu.memory_space<vmem>>, vector<2x128xf32>,
    return
  }
  func.func @transform_0(%arg0: i32, %arg1: i32) -> (i32, i32, i32) {
    %c0_i32 = arith.constant 0 : i32
    %c0_i32_0 = arith.constant 0 : i32
    return %arg0, %arg1, %c0_i32 : i32, i32, i32
  }
  func.func @transform_1(%arg0: i32, %arg1: i32) -> (i32, i32) {
    %c0_i32 = arith.constant 0 : i32
    %c0_i32_0 = arith.constant 0 : i32
    %c0_i32_1 = arith.constant 0 : i32
    return %c0_i32, %c0_i32_0 : i32, i32
  }
  func.func @transform_2(%arg0: i32, %arg1: i32) -> (i32, i32) {
    %c0_i32 = arith.constant 0 : i32
    %c0_i32_0 = arith.constant 0 : i32
    %c0_i32_1 = arith.constant 0 : i32
    return %c0_i32, %c0_i32_0 : i32, i32
  }
  func.func @transform_3(%arg0: i32, %arg1: i32) -> (i32, i32, i32) {
    %c0_i32 = arith.constant 0 : i32
    %c0_i32_0 = arith.constant 0 : i32
    return %arg0, %arg1, %c0_i32 : i32, i32, i32
  }
}

</mosaic_0001>

<bundles_post_ra>
// kernel: bn_gru_forward.1
= control target key start
LH: loop header
LB: loop body
LE: loop exit
PB: predicated region body
PF: predicated region fallthrough
CT: control target
= control target key end

     0   :  { %v3863_v3 = vmov 0.0|0.0   ;;  %v3864_v4 = vmov 0.0   ;;  %vm3865_vm0 = vmmov 0   ;;  %s4915_s1 = inlined_call_operand.vmem [shape: f32[128,384], index: 1, kind: input, shape index: {}]   ;;  %s4916_s0 = inlined_call_operand.vmem [shape: f32[2,8,384], index: 0, kind: input, shape index: {}]   ;;  %s4917_s2 = inlined_call_operand.vmem [shape: f32[1,128], index: 2, kind: input, shape index: {}]   ;;  %s4918_s3 = inlined_call_operand.vmem [shape: f32[2,8,128], index: 3, kind: output, shape index: {}]  }
   0x1   :  { %v25_v0 = vld [vmem:[%s4915_s1 + $0x8] sm:$0xff]  ;;  %v28_v1 = vld [vmem:[%s4915_s1 + $0x20] sm:$0xff]  ;;  %3282 = vmatprep.subr.bf16.mxu1 %v3863_v3  ;;  %136 = vmatprep.mubr.f32.mxu0 %v3864_v4  ;;  %18 = vst [vmem:[#allocation2] sm:$0x3] %v3864_v4  ;;  %v27_v6 = vld [vmem:[%s4915_s1 + $0x18] sm:$0xff] }
   0x2   :  { %v24_v2 = vld [vmem:[%s4915_s1] sm:$0xff]  ;;  %v3899_v5 = vpack.c.bf16 %v28_v1, %v25_v0  ;;  %v31_v7 = vld [vmem:[%s4915_s1 + $0x38] sm:$0xff]  ;;  %v34_v8 = vld [vmem:[%s4915_s1 + $0x50] sm:$0xff]  ;;  %3002 = vmatprep.mubr.msk.f32.mxu1 %vm3865_vm0, %v3864_v4 }
   0x3   :  { %v3912_v9 = vpack.c.bf16 %v27_v6, %v24_v2  ;;  %v3914_v10 = vpack.c.bf16 %v34_v8, %v31_v7  ;;  %v30_v11 = vld [vmem:[%s4915_s1 + $0x30] sm:$0xff]  ;;  %v33_v12 = vld [vmem:[%s4915_s1 + $0x48] sm:$0xff]  ;;  %v40_v14 = vld [vmem:[%s4915_s1 + $0x80] sm:$0xff] }
   0x4   :  { %v37_v13 = vld [vmem:[%s4915_s1 + $0x68] sm:$0xff]  ;;  %3251 = vmatprep.subr.bf16.mxu0 %v3899_v5  ;;  %v3930_v15 = vpack.c.bf16 %v33_v12, %v30_v11  ;;  %v36_v17 = vld [vmem:[%s4915_s1 + $0x60] sm:$0xff]  ;;  %v39_v18 = vld [vmem:[%s4915_s1 + $0x78] sm:$0xff] }
   0x5   :  { %3253 = vmatpush1.bf16.msra.mxu0 %v3912_v9  ;;  %v3933_v16 = vpack.c.bf16 %v40_v14, %v37_v13  ;;  %v43_v19 = vld [vmem:[%s4915_s1 + $0x98] sm:$0xff]  ;;  %v46_v20 = vld [vmem:[%s4915_s1 + $0xb0] sm:$0xff]  ;;  %v3948_v21 = vpack.c.bf16 %v39_v18, %v36_v17  ;;  %v45_v24 = vld [vmem:[%s4915_s1 + $0xa8] sm:$0xff]  ;;  %v3866_v18 = vmov 1966171168  }
   0x6   :  { %3255 = vmatprep.subr.bf16.mxu0 %v3914_v10  ;;  %v42_v22 = vld [vmem:[%s4915_s1 + $0x90] sm:$0xff]  ;;  %v3954_v23 = vpack.c.bf16 %v46_v20, %v43_v19  ;;  %v29_v26 = vld [vmem:[%s4915_s1 + $0x28] sm:$0xff]  ;;  %v52_v28 = vld [vmem:[%s4915_s1 + $0xe0] sm:$0xff]  ;;  %v215_v19 = vunpack.c.l.s4 %v3866_v18  ;;  %v217_v20 = vlaneseq }
   0x7   :  { %v26_v25 = vld [vmem:[%s4915_s1 + $0x10] sm:$0xff]  ;;  %v49_v27 = vld [vmem:[%s4915_s1 + $0xc8] sm:$0xff]  ;;  %v32_v30 = vld [vmem:[%s4915_s1 + $0x40] sm:$0xff]  ;;  %v3980_v32 = vpack.c.bf16 %v45_v24, %v42_v22 }
   0x8   :  { %v3971_v29 = vpack.c.bf16 %v29_v26, %v26_v25  ;;  %v35_v31 = vld [vmem:[%s4915_s1 + $0x58] sm:$0xff]  ;;  %v48_v33 = vld [vmem:[%s4915_s1 + $0xc0] sm:$0xff]  ;;  %v3989_v35 = vpack.c.bf16 %v52_v28, %v49_v27  ;;  %v38_v37 = vld [vmem:[%s4915_s1 + $0x70] sm:$0xff]  ;;  %v216_v22 = vunpack.c.0.s8 %v215_v19  ;;  %v218_v24 = vshrl.u32 %v217_v20, 7 }
   0x9   :  { %3257 = vmatpush1.bf16.msra.mxu0 %v3930_v15  ;;  %v3986_v34 = vpack.c.bf16 %v35_v31, %v32_v30  ;;  %v51_v36 = vld [vmem:[%s4915_s1 + $0xd8] sm:$0xff]  ;;  %v41_v38 = vld [vmem:[%s4915_s1 + $0x88] sm:$0xff]  ;;  %v58_v40 = vld [vmem:[%s4915_s1 + $0x110] sm:$0xff] }
   0xa   :  { %3259 = vmatprep.subr.bf16.mxu0 %v3933_v16  ;;  %3284 = vmatpush3.bf16.msra.mxu1 %v3971_v29  ;;  %v55_v39 = vld [vmem:[%s4915_s1 + $0xf8] sm:$0xff]  ;;  %v4008_v41 = vpack.c.bf16 %v51_v36, %v48_v33  ;;  %v54_v42 = vld [vmem:[%s4915_s1 + $0xf0] sm:$0xff]  ;;  %v4014_v43 = vpack.c.bf16 %v41_v38, %v38_v37  ;;  %v57_v45 = vld [vmem:[%s4915_s1 + $0x108] sm:$0xff]  ;;  %v4156_v25 = vsub.s32 %v216_v22, %v218_v24 }
   0xb   :  { %3285 = vmatprep.subr.bf16.mxu1 %v3863_v3  ;;  %v4017_v44 = vpack.c.bf16 %v58_v40, %v55_v39  ;;  %v44_v46 = vld [vmem:[%s4915_s1 + $0xa0] sm:$0xff]  ;;  %v47_v47 = vld [vmem:[%s4915_s1 + $0xb8] sm:$0xff]  ;;  %v61_v48 = vld [vmem:[%s4915_s1 + $0x128] sm:$0xff]  ;;  %v4036_v50 = vpack.c.bf16 %v57_v45, %v54_v42 }
   0xc   :  { %v64_v49 = vld [vmem:[%s4915_s1 + $0x140] sm:$0xff]  ;;  %v4042_v52 = vpack.c.bf16 %v47_v47, %v44_v46  ;;  %v63_v54 = vld [vmem:[%s4915_s1 + $0x138] sm:$0xff]  ;;  %v50_v55 = vld [vmem:[%s4915_s1 + $0xd0] sm:$0xff] }
   0xd   :  { %3261 = vmatpush1.bf16.msra.mxu0 %v3948_v21  ;;  %v60_v51 = vld [vmem:[%s4915_s1 + $0x120] sm:$0xff]  ;;  %v4045_v53 = vpack.c.bf16 %v64_v49, %v61_v48  ;;  %v53_v56 = vld [vmem:[%s4915_s1 + $0xe8] sm:$0xff]  ;;  %v67_v57 = vld [vmem:[%s4915_s1 + $0x158] sm:$0xff] }
   0xe   :  { %3263 = vmatprep.subr.bf16.mxu0 %v3954_v23  ;;  %3287 = vmatpush3.bf16.msra.mxu1 %v3986_v34  ;;  %v70_v58 = vld [vmem:[%s4915_s1 + $0x170] sm:$0xff]  ;;  %v4064_v59 = vpack.c.bf16 %v63_v54, %v60_v51  ;;  %v4070_v61 = vpack.c.bf16 %v53_v56, %v50_v55  ;;  %v69_v63 = vld [vmem:[%s4915_s1 + $0x168] sm:$0xff]  ;;  %v56_v0 = vld [vmem:[%s4915_s1 + $0x100] sm:$0xff] }
   0xf   :  { %3288 = vmatprep.subr.bf16.mxu1 %v3863_v3  ;;  %v66_v60 = vld [vmem:[%s4915_s1 + $0x150] sm:$0xff]  ;;  %v4073_v62 = vpack.c.bf16 %v70_v58, %v67_v57  ;;  %v59_v1 = vld [vmem:[%s4915_s1 + $0x118] sm:$0xff]  ;;  %v65_v8 = vld [vmem:[%s4915_s1 + $0x148] sm:$0xff] }
  0x10   :  { %v4086_v2 = vpack.c.bf16 %v69_v63, %v66_v60  ;;  %v4089_v6 = vpack.c.bf16 %v59_v1, %v56_v0  ;;  %v62_v7 = vld [vmem:[%s4915_s1 + $0x130] sm:$0xff]  ;;  %v4100_v11 = vld [vmem:[#allocation2] sm:$0x3]  ;;  %v71_v14 = vld [vmem:[%s4915_s1 + $0x178] sm:$0xff] }
  0x11   :  { %3265 = vmatpush1.bf16.msra.mxu0 %v3980_v32  ;;  %v4103_v12 = vpack.c.bf16 %v65_v8, %v62_v7  ;;  %v68_v13 = vld [vmem:[%s4915_s1 + $0x160] sm:$0xff] }
  0x12   :  { %3267 = vmatprep.subr.bf16.mxu0 %v3989_v35  ;;  %3290 = vmatpush3.bf16.msra.mxu1 %v4014_v43  ;;  %v4115_v17 = vpack.c.bf16 %v71_v14, %v68_v13  ;;  %v2785_v33 = vld [vmem:[%s4916_s0 + $0x18] ss:$8 sm:$0x7] }
  0x13   :  { %3291 = vmatprep.subr.bf16.mxu1 %v3863_v3  ;;  %v4171_v47 = vld [vmem:[%s4917_s2] ss:$0 sm:$0xff]  ;;  %v255_v63 = vrot.slane %v2785_v33, 1  ;;  %v332_v24 = vrot.slane %v2785_v33, 2 }
  0x15   :  { %3269 = vmatpush1.bf16.msra.mxu0 %v4008_v41 }
  0x16   :  { %3271 = vmatprep.subr.bf16.mxu0 %v4017_v44  ;;  %3293 = vmatpush3.bf16.msra.mxu1 %v4042_v52 }
  0x17   :  { %3294 = vmatprep.subr.bf16.mxu1 %v3863_v3 }
  0x19   :  { %3273 = vmatpush1.bf16.msra.mxu0 %v4036_v50 }
  0x1a   :  { %3275 = vmatprep.subr.bf16.mxu0 %v4045_v53  ;;  %3296 = vmatpush3.bf16.msra.mxu1 %v4070_v61 }
  0x1b   :  { %3297 = vmatprep.subr.bf16.mxu1 %v3863_v3 }
  0x1d   :  { %3277 = vmatpush1.bf16.msra.mxu0 %v4064_v59 }
  0x1e   :  { %3279 = vmatprep.subr.bf16.mxu0 %v4073_v62  ;;  %3299 = vmatpush3.bf16.msra.mxu1 %v4089_v6 }
  0x1f   :  { %3300 = vmatprep.subr.bf16.mxu1 %v3863_v3 }
  0x21   :  { %3281 = vmatpush1.bf16.msra.mxu0 %v4086_v2 }
  0x22   :  { %3307 = vmatprep.subr.bf16.mxu0 %v3899_v5  ;;  %3302 = vmatpush3.bf16.msra.mxu1 %v4103_v12 }
  0x23   :  { %3303 = vmatprep.subr.bf16.mxu1 %v3863_v3 }
  0x24   :  { %137 = vmatmul.mubr.f32.vlgmr.msra.gmra.mrb[0].mxu0 %v4100_v11 }
  0x25   :  { %3309 = vmatpush1.bf16.msra.mxu0 %v3912_v9  ;;  %523 = vmatprep.mubr.f32.mxu0 %v3864_v4 }
  0x26   :  { %3311 = vmatprep.subr.bf16.mxu0 %v3914_v10  ;;  %3305 = vmatpush3.bf16.msra.mxu1 %v4115_v17 }
  0x27   :  { %3338 = vmatprep.subr.bf16.mxu1 %v3863_v3 }
  0x29   :  { %3313 = vmatpush1.bf16.msra.mxu0 %v3930_v15  ;;  %3003 = vmatmul.mubr.f32.vlgmr.msra.gmra.mrb[0].mxu1 %v4100_v11 }
  0x2a   :  { %3315 = vmatprep.subr.bf16.mxu0 %v3933_v16  ;;  %3340 = vmatpush3.bf16.msra.mxu1 %v3971_v29 }
  0x2b   :  { %3341 = vmatprep.subr.bf16.mxu1 %v3863_v3  ;;  %3037 = vmatprep.mubr.msk.f32.mxu1 %vm3865_vm0, %v3864_v4 }
  0x2d   :  { %3317 = vmatpush1.bf16.msra.mxu0 %v3948_v21 }
  0x2e   :  { %3319 = vmatprep.subr.bf16.mxu0 %v3954_v23  ;;  %3343 = vmatpush3.bf16.msra.mxu1 %v3986_v34 }
  0x2f   :  { %3344 = vmatprep.subr.bf16.mxu1 %v3863_v3 }
  0x31   :  { %3321 = vmatpush1.bf16.msra.mxu0 %v3980_v32 }
  0x32   :  { %3323 = vmatprep.subr.bf16.mxu0 %v3989_v35  ;;  %3346 = vmatpush3.bf16.msra.mxu1 %v4014_v43 }
  0x33   :  { %3347 = vmatprep.subr.bf16.mxu1 %v3863_v3 }
  0x35   :  { %3325 = vmatpush1.bf16.msra.mxu0 %v4008_v41 }
  0x36   :  { %3327 = vmatprep.subr.bf16.mxu0 %v4017_v44  ;;  %3349 = vmatpush3.bf16.msra.mxu1 %v4042_v52 }
  0x37   :  { %3350 = vmatprep.subr.bf16.mxu1 %v3863_v3 }
  0x39   :  { %3329 = vmatpush1.bf16.msra.mxu0 %v4036_v50 }
  0x3a   :  { %3331 = vmatprep.subr.bf16.mxu0 %v4045_v53  ;;  %3352 = vmatpush3.bf16.msra.mxu1 %v4070_v61 }
  0x3b   :  { %3353 = vmatprep.subr.bf16.mxu1 %v3863_v3 }
  0x3d   :  { %3333 = vmatpush1.bf16.msra.mxu0 %v4064_v59 }
  0x3e   :  { %3335 = vmatprep.subr.bf16.mxu0 %v4073_v62  ;;  %3355 = vmatpush3.bf16.msra.mxu1 %v4089_v6 }
  0x3f   :  { %3356 = vmatprep.subr.bf16.mxu1 %v3863_v3 }
  0x41   :  { %3337 = vmatpush1.bf16.msra.mxu0 %v4086_v2 }
  0x42   :  { %3363 = vmatprep.subr.bf16.mxu0 %v3899_v5  ;;  %3358 = vmatpush3.bf16.msra.mxu1 %v4103_v12  ;;  %v21_v5 = vld [vmem:[%s4916_s0] ss:$8 sm:$0x7] }
  0x43   :  { %3359 = vmatprep.subr.bf16.mxu1 %v3863_v3  ;;  %v254_v57 = vrot.slane %v21_v5, 1  ;;  %v331_v18 = vrot.slane %v21_v5, 2 }
  0x46   :  { %3361 = vmatpush3.bf16.msra.mxu1 %v4115_v17 }
  0x47   :  { %3394 = vmatprep.subr.bf16.mxu1 %v3863_v3 }
  0xf7   :  { %v138_v26 = vpop.f32.mrb[0].mxu0 }
  0xf8   :  { %v220_v27 = vrot.slane %v138_v26, %v4156_v25  ;;  %v140_v28 = vpop.f32.mrb[1].mxu0 }
  0xf9   :  { %v265_v46 = vrot.slane %v140_v28, %v4156_v25 }
  0xfa   :  { %v221_v30 = vcombine.high %v220_v27, %v220_v27  ;;  %v228_v31 = vrot.slane %v220_v27, %v4156_v25 }
  0xfb   :  { %v266_v54 = vcombine.high %v265_v46, %v265_v46  ;;  %v273_v58 = vrot.slane %v265_v46, %v4156_v25 }
  0xfc   :  { %v235_v36 = vrot.slane %v221_v30, %v4156_v25  ;;  %v238_v37 = vadd.f32 %v228_v31, %v21_v5  ;;  %v209_v40 = vpop.f32.mrb[0].mxu1 }
  0xfd   :  { %v3004_v45 = vpop.f32.mrb[1].mxu1  ;;  %v303_v49 = vadd.f32 %v4171_v47, %v209_v40  ;;  %v280_v0 = vrot.slane %v266_v54, %v4156_v25  ;;  %v283_v1 = vadd.f32 %v273_v58, %v254_v57 }
  0xfe   :  { %v239_v38 = vadd.f32 %v2785_v33, %v235_v36  ;;  %v2786_v39 = vmul.f32 -1.442695, %v238_v37 }
  0xff   :  { %v311_v60 = vrot.slane %v303_v49, %v4156_v25  ;;  %v284_v8 = vadd.f32 %v280_v0, %v255_v63  ;;  %v2788_v14 = vmul.f32 -1.442695, %v283_v1 }
 0x100   :  { %3702 = vpow2.f32 %v2786_v39  ;;  %v2787_v42 = vmul.f32 -1.442695, %v239_v38 }
 0x101   :  { %v312_v7 = vcombine.high %v311_v60, %v311_v60  ;;  %v319_v13 = vrot.slane %v311_v60, %v4156_v25  ;;  %v2789_v22 = vmul.f32 -1.442695, %v284_v8 }
 0x102   :  { %3704 = vpow2.f32 %v2787_v42 }
 0x103   :  { %v326_v19 = vrot.slane %v312_v7, %v4156_v25 }
 0x10a   :  { %v3703_v48 = vpop.eup %3702 }
 0x10b   :  { %v246_v51 = vadd.f32 1.0, %v3703_v48 }
 0x10c   :  { %v3705_v55 = vpop.eup %3704 }
 0x10d   :  { %v247_v56 = vadd.f32 1.0, %v3705_v55  ;;  %3706 = vrcp.f32 %v246_v51 }
 0x10f   :  { %3708 = vrcp.f32 %v247_v56 }
 0x110   :  { %3710 = vpow2.f32 %v2788_v14 }
 0x111   :  { %3712 = vpow2.f32 %v2789_v22 }
 0x117   :  { %v3707_v20 = vpop.eup %3706 }
 0x118   :  { %v329_v26 = vmul.f32 %v3707_v20, %v319_v13 }
 0x119   :  { %v3709_v27 = vpop.eup %3708 }
 0x11a   :  { %v330_v28 = vmul.f32 %v3709_v27, %v326_v19  ;;  %v335_v30 = vadd.f32 %v331_v18, %v329_v26  ;;  %v3711_v36 = vpop.eup %3710 }
 0x11b   :  { %v3713_v37 = vpop.eup %3712  ;;  %v291_v38 = vadd.f32 1.0, %v3711_v36 }
 0x11c   :  { %v336_v31 = vadd.f32 %v332_v24, %v330_v28  ;;  %3714 = vtanh.f32 %v335_v30  ;;  %v292_v5 = vadd.f32 1.0, %v3713_v37 }
 0x11e   :  { %3716 = vtanh.f32 %v336_v31 }
 0x11f   :  { %3718 = vrcp.f32 %v291_v38 }
 0x120   :  { %3720 = vrcp.f32 %v292_v5 }
 0x126   :  { %v3715_v39 = vpop.eup %3714 }
 0x128   :  { %v3717_v40 = vpop.eup %3716 }
 0x129   :  { %v341_v42 = vcombine.low %v3715_v39, %v3717_v40  ;;  %v3719_v54 = vpop.eup %3718 }
 0x12a   :  { %v3721_v57 = vpop.eup %3720 }
 0x12b   :  { %v348_v45 = vrot.slane %v341_v42, %v4156_v25 }
 0x12d   :  { %v355_v33 = vrot.slane %v348_v45, %v4156_v25 }
 0x12f   :  { %v357_v46 = vsub.f32 %v4100_v11, %v355_v33 }
 0x131   :  { %v365_v48 = vrot.slane %v357_v46, %v4156_v25 }
 0x133   :  { %v366_v49 = vcombine.high %v365_v48, %v365_v48  ;;  %v373_v51 = vrot.slane %v365_v48, %v4156_v25 }
 0x135   :  { %v380_v55 = vrot.slane %v366_v49, %v4156_v25  ;;  %v383_v56 = vmul.f32 %v3719_v54, %v373_v51 }
 0x137   :  { %v384_v58 = vmul.f32 %v3721_v57, %v380_v55  ;;  %v4185_v60 = vadd.f32 %v3715_v39, %v383_v56 }
 0x139   :  { %v4187_v63 = vadd.f32 %v3717_v40, %v384_v58  ;;  %387 = vst [vmem:[%s4918_s3] sm:$0x1] %v4185_v60 }
 0x13b   :  { %388 = vst [vmem:[%s4918_s3 + $0x8] sm:$0x1] %v4187_v63  ;;  %v443_v11 = vcombine.low %v4185_v60, %v4187_v63 }
 0x13d   :  { %v450_v0 = vrot.slane %v443_v11, %v4156_v25 }
 0x13f   :  { %v457_v1 = vrot.slane %v450_v0, %v4156_v25 }
 0x141   :  { %524 = vmatmul.mubr.f32.vlgmr.msra.gmra.mrb[2].mxu0 %v457_v1  ;;  %3038 = vmatmul.mubr.f32.vlgmr.msra.gmra.mrb[2].mxu1 %v457_v1 }
 0x142   :  { %3365 = vmatpush1.bf16.msra.mxu0 %v3912_v9  ;;  %3396 = vmatpush3.bf16.msra.mxu1 %v3971_v29 }
 0x143   :  { %3367 = vmatprep.subr.bf16.mxu0 %v3914_v10  ;;  %3397 = vmatprep.subr.bf16.mxu1 %v3863_v3 }
 0x144   :  { %862 = vmatprep.mubr.f32.mxu0 %v3864_v4  ;;  %3072 = vmatprep.mubr.msk.f32.mxu1 %vm3865_vm0, %v3864_v4 }
 0x146   :  { %3369 = vmatpush1.bf16.msra.mxu0 %v3930_v15  ;;  %3399 = vmatpush3.bf16.msra.mxu1 %v3986_v34 }
 0x147   :  { %3371 = vmatprep.subr.bf16.mxu0 %v3933_v16  ;;  %3400 = vmatprep.subr.bf16.mxu1 %v3863_v3 }
 0x14a   :  { %3373 = vmatpush1.bf16.msra.mxu0 %v3948_v21  ;;  %3402 = vmatpush3.bf16.msra.mxu1 %v4014_v43 }
 0x14b   :  { %3375 = vmatprep.subr.bf16.mxu0 %v3954_v23  ;;  %3403 = vmatprep.subr.bf16.mxu1 %v3863_v3  ;;  %v2791_v23 = vld [vmem:[%s4916_s0 + $0x1] ss:$8 sm:$0x7] }
 0x14c   :  { %v641_v8 = vrot.slane %v2791_v23, 1  ;;  %v712_v39 = vrot.slane %v2791_v23, 2 }
 0x14e   :  { %3377 = vmatpush1.bf16.msra.mxu0 %v3980_v32  ;;  %3405 = vmatpush3.bf16.msra.mxu1 %v4042_v52 }
 0x14f   :  { %3379 = vmatprep.subr.bf16.mxu0 %v3989_v35  ;;  %3406 = vmatprep.subr.bf16.mxu1 %v3863_v3 }
 0x152   :  { %3381 = vmatpush1.bf16.msra.mxu0 %v4008_v41  ;;  %3408 = vmatpush3.bf16.msra.mxu1 %v4070_v61 }
 0x153   :  { %3383 = vmatprep.subr.bf16.mxu0 %v4017_v44  ;;  %3409 = vmatprep.subr.bf16.mxu1 %v3863_v3  ;;  %v2792_v44 = vld [vmem:[%s4916_s0 + $0x19] ss:$8 sm:$0x7] }
 0x154   :  { %v642_v14 = vrot.slane %v2792_v44, 1  ;;  %v713_v45 = vrot.slane %v2792_v44, 2 }
 0x156   :  { %3385 = vmatpush1.bf16.msra.mxu0 %v4036_v50  ;;  %3411 = vmatpush3.bf16.msra.mxu1 %v4089_v6 }
 0x157   :  { %3387 = vmatprep.subr.bf16.mxu0 %v4045_v53  ;;  %3412 = vmatprep.subr.bf16.mxu1 %v3863_v3 }
 0x15a   :  { %3389 = vmatpush1.bf16.msra.mxu0 %v4064_v59  ;;  %3414 = vmatpush3.bf16.msra.mxu1 %v4103_v12 }
 0x15b   :  { %3391 = vmatprep.subr.bf16.mxu0 %v4073_v62  ;;  %3415 = vmatprep.subr.bf16.mxu1 %v3863_v3 }
 0x15e   :  { %3393 = vmatpush1.bf16.msra.mxu0 %v4086_v2  ;;  %3417 = vmatpush3.bf16.msra.mxu1 %v4115_v17 }
 0x15f   :  { %3450 = vmatprep.subr.bf16.mxu1 %v3863_v3 }
 0x214   :  { %v525_v9 = vpop.f32.mrb[2].mxu0  ;;  %v596_v10 = vpop.f32.mrb[2].mxu1 }
 0x215   :  { %v607_v15 = vrot.slane %v525_v9, %v4156_v25  ;;  %v527_v16 = vpop.f32.mrb[3].mxu0  ;;  %v3039_v21 = vpop.f32.mrb[3].mxu1  ;;  %v684_v30 = vadd.f32 %v4171_v47, %v596_v10 }
 0x216   :  { %v652_v41 = vrot.slane %v527_v16, %v4156_v25 }
 0x217   :  { %v608_v32 = vcombine.high %v607_v15, %v607_v15  ;;  %v615_v35 = vrot.slane %v607_v15, %v4156_v25  ;;  %v692_v36 = vrot.slane %v684_v30, %v4156_v25  ;;  %v1102_v30 = vld [vmem:[%s4915_s1 + $0xf8] sm:$0xff] }
 0x218   :  { %v653_v2 = vcombine.high %v652_v41, %v652_v41  ;;  %v660_v13 = vrot.slane %v652_v41, %v4156_v25  ;;  %v1080_v41 = vld [vmem:[%s4915_s1 + $0x48] sm:$0xff] }
 0x219   :  { %v622_v50 = vrot.slane %v608_v32, %v4156_v25  ;;  %v625_v53 = vadd.f32 %v2791_v23, %v615_v35  ;;  %v693_v37 = vcombine.high %v692_v36, %v692_v36  ;;  %v700_v40 = vrot.slane %v692_v36, %v4156_v25  ;;  %v1077_v35 = vld [vmem:[%s4915_s1 + $0x30] sm:$0xff] }
 0x21a   :  { %v667_v18 = vrot.slane %v653_v2, %v4156_v25  ;;  %v670_v19 = vadd.f32 %v660_v13, %v641_v8  ;;  %v1086_v2 = vld [vmem:[%s4915_s1 + $0x78] sm:$0xff]  ;;  %v1093_v13 = vld [vmem:[%s4915_s1 + $0xb0] sm:$0xff] }
 0x21b   :  { %v626_v59 = vadd.f32 %v2792_v44, %v622_v50  ;;  %v2793_v62 = vmul.f32 -1.442695, %v625_v53  ;;  %v707_v33 = vrot.slane %v693_v37, %v4156_v25  ;;  %v4320_v44 = vpack.c.bf16 %v1080_v41, %v1077_v35  ;;  %v1084_v50 = vld [vmem:[%s4915_s1 + $0x68] sm:$0xff]  ;;  %v1087_v53 = vld [vmem:[%s4915_s1 + $0x80] sm:$0xff]  ;;  %v1090_v8 = vld [vmem:[%s4915_s1 + $0x98] sm:$0xff] }
 0x21c   :  { %v671_v20 = vadd.f32 %v667_v18, %v642_v14  ;;  %v2795_v22 = vmul.f32 -1.442695, %v670_v19  ;;  %v1089_v14 = vld [vmem:[%s4915_s1 + $0x90] sm:$0xff]  ;;  %v4351_v18 = vpack.c.bf16 %v1093_v13, %v1090_v8  ;;  %v1092_v19 = vld [vmem:[%s4915_s1 + $0xa8] sm:$0xff] }
 0x21d   :  { %3722 = vpow2.f32 %v2793_v62  ;;  %v2794_v7 = vmul.f32 -1.442695, %v626_v59  ;;  %v4330_v59 = vpack.c.bf16 %v1087_v53, %v1084_v50  ;;  %v1083_v62 = vld [vmem:[%s4915_s1 + $0x60] sm:$0xff] }
 0x21e   :  { %v2796_v26 = vmul.f32 -1.442695, %v671_v20  ;;  %v1096_v20 = vld [vmem:[%s4915_s1 + $0xc8] sm:$0xff] }
 0x21f   :  { %3724 = vpow2.f32 %v2794_v7  ;;  %v4338_v7 = vpack.c.bf16 %v1086_v2, %v1083_v62 }
 0x220   :  { %3726 = vpow2.f32 %v2795_v22  ;;  %v1099_v22 = vld [vmem:[%s4915_s1 + $0xe0] sm:$0xff] }
 0x227   :  { %v3723_v24 = vpop.eup %3722 }
 0x228   :  { %v633_v27 = vadd.f32 1.0, %v3723_v24  ;;  %v4362_v24 = vpack.c.bf16 %v1092_v19, %v1089_v14 }
 0x229   :  { %v3725_v28 = vpop.eup %3724 }
 0x22a   :  { %v634_v31 = vadd.f32 1.0, %v3725_v28  ;;  %3728 = vrcp.f32 %v633_v27  ;;  %v3727_v38 = vpop.eup %3726  ;;  %v1095_v27 = vld [vmem:[%s4915_s1 + $0xc0] sm:$0xff]  ;;  %v1098_v28 = vld [vmem:[%s4915_s1 + $0xd8] sm:$0xff] }
 0x22b   :  { %3730 = vpow2.f32 %v2796_v26  ;;  %v678_v49 = vadd.f32 1.0, %v3727_v38  ;;  %v4364_v26 = vpack.c.bf16 %v1099_v22, %v1096_v20  ;;  %v4380_v36 = vpack.c.bf16 %v1098_v28, %v1095_v27  ;;  %v1101_v38 = vld [vmem:[%s4915_s1 + $0xf0] sm:$0xff] }
 0x22c   :  { %3732 = vrcp.f32 %v634_v31  ;;  %v1105_v31 = vld [vmem:[%s4915_s1 + $0x110] sm:$0xff] }
 0x22d   :  { %v4383_v37 = vpack.c.bf16 %v1105_v31, %v1102_v30 }
 0x234   :  { %v3729_v5 = vpop.eup %3728 }
 0x235   :  { %v3731_v42 = vpop.eup %3730  ;;  %v710_v46 = vmul.f32 %v3729_v5, %v700_v40  ;;  %v1108_v40 = vld [vmem:[%s4915_s1 + $0x128] sm:$0xff]  ;;  %v1111_v5 = vld [vmem:[%s4915_s1 + $0x140] sm:$0xff] }
 0x236   :  { %v3733_v48 = vpop.eup %3732  ;;  %v679_v56 = vadd.f32 1.0, %v3731_v42 }
 0x237   :  { %v711_v51 = vmul.f32 %v3733_v48, %v707_v33  ;;  %v716_v54 = vadd.f32 %v712_v39, %v710_v46  ;;  %v1104_v39 = vld [vmem:[%s4915_s1 + $0x108] sm:$0xff]  ;;  %v1107_v33 = vld [vmem:[%s4915_s1 + $0x120] sm:$0xff]  ;;  %v1110_v46 = vld [vmem:[%s4915_s1 + $0x138] sm:$0xff] }
 0x238   :  { %v4398_v42 = vpack.c.bf16 %v1104_v39, %v1101_v38  ;;  %v1114_v48 = vld [vmem:[%s4915_s1 + $0x158] sm:$0xff] }
 0x239   :  { %v717_v55 = vadd.f32 %v713_v45, %v711_v51  ;;  %3734 = vtanh.f32 %v716_v54  ;;  %v4401_v45 = vpack.c.bf16 %v1111_v5, %v1108_v40  ;;  %v4416_v51 = vpack.c.bf16 %v1110_v46, %v1107_v33 }
 0x23a   :  { %3736 = vrcp.f32 %v678_v49  ;;  %v1117_v49 = vld [vmem:[%s4915_s1 + $0x170] sm:$0xff] }
 0x23b   :  { %3738 = vtanh.f32 %v717_v55  ;;  %v4419_v54 = vpack.c.bf16 %v1117_v49, %v1114_v48  ;;  %v1113_v55 = vld [vmem:[%s4915_s1 + $0x150] sm:$0xff] }
 0x23c   :  { %3740 = vrcp.f32 %v679_v56  ;;  %v1116_v56 = vld [vmem:[%s4915_s1 + $0x168] sm:$0xff] }
 0x243   :  { %v3735_v57 = vpop.eup %3734 }
 0x244   :  { %v3737_v58 = vpop.eup %3736  ;;  %v720_v11 = vsub.f32 %v4185_v60, %v3735_v57 }
 0x245   :  { %v3739_v0 = vpop.eup %3738 }
 0x246   :  { %v721_v1 = vsub.f32 %v4187_v63, %v3739_v0  ;;  %v722_v9 = vmul.f32 %v3737_v58, %v720_v11  ;;  %v3741_v10 = vpop.eup %3740 }
 0x248   :  { %v723_v15 = vmul.f32 %v3741_v10, %v721_v1  ;;  %v4253_v16 = vadd.f32 %v3735_v57, %v722_v9  ;;  %v4428_v57 = vpack.c.bf16 %v1116_v56, %v1113_v55  ;;  %v2797_v10 = vld [vmem:[%s4916_s0 + $0x2] ss:$8 sm:$0x7] }
 0x249   :  { %v980_v35 = vrot.slane %v2797_v10, 1  ;;  %v1051_v38 = vrot.slane %v2797_v10, 2 }
 0x24a   :  { %v4255_v21 = vadd.f32 %v3739_v0, %v723_v15  ;;  %726 = vst [vmem:[%s4918_s3 + $0x1] sm:$0x1] %v4253_v16 }
 0x24c   :  { %727 = vst [vmem:[%s4918_s3 + $0x9] sm:$0x1] %v4255_v21  ;;  %v782_v60 = vcombine.low %v4253_v16, %v4255_v21 }
 0x24e   :  { %v789_v63 = vrot.slane %v782_v60, %v4156_v25 }
 0x250   :  { %v796_v23 = vrot.slane %v789_v63, %v4156_v25 }
 0x252   :  { %863 = vmatmul.mubr.f32.vlgmr.msra.gmra.mrb[4].mxu0 %v796_v23  ;;  %3073 = vmatmul.mubr.f32.vlgmr.msra.gmra.mrb[4].mxu1 %v796_v23  ;;  %v2798_v23 = vld [vmem:[%s4916_s0 + $0x1a] ss:$8 sm:$0x7] }
 0x253   :  { %3452 = vmatpush3.bf16.msra.mxu1 %v3971_v29  ;;  %1201 = vmatprep.mubr.f32.mxu0 %v3864_v4  ;;  %v1072_v29 = vld [vmem:[%s4915_s1 + $0x8] sm:$0xff]  ;;  %v981_v50 = vrot.slane %v2798_v23, 1  ;;  %v1052_v33 = vrot.slane %v2798_v23, 2 }
 0x254   :  { %3453 = vmatprep.subr.bf16.mxu1 %v3863_v3  ;;  %3107 = vmatprep.mubr.msk.f32.mxu1 %vm3865_vm0, %v3864_v4 }
 0x257   :  { %3455 = vmatpush3.bf16.msra.mxu1 %v3986_v34  ;;  %v1075_v34 = vld [vmem:[%s4915_s1 + $0x20] sm:$0xff] }
 0x258   :  { %3456 = vmatprep.subr.bf16.mxu1 %v3863_v3 }
 0x25b   :  { %3458 = vmatpush3.bf16.msra.mxu1 %v4014_v43  ;;  %v4294_v43 = vpack.c.bf16 %v1075_v34, %v1072_v29 }
 0x25c   :  { %3459 = vmatprep.subr.bf16.mxu1 %v3863_v3 }
 0x25d   :  { %3419 = vmatprep.subr.bf16.mxu0 %v4294_v43 }
 0x25f   :  { %3461 = vmatpush3.bf16.msra.mxu1 %v4042_v52  ;;  %v1071_v52 = vld [vmem:[%s4915_s1] sm:$0xff] }
 0x260   :  { %3462 = vmatprep.subr.bf16.mxu1 %v3863_v3 }
 0x263   :  { %3464 = vmatpush3.bf16.msra.mxu1 %v4070_v61  ;;  %v1074_v61 = vld [vmem:[%s4915_s1 + $0x18] sm:$0xff] }
 0x264   :  { %3465 = vmatprep.subr.bf16.mxu1 %v3863_v3 }
 0x267   :  { %3467 = vmatpush3.bf16.msra.mxu1 %v4089_v6  ;;  %v4302_v6 = vpack.c.bf16 %v1074_v61, %v1071_v52 }
 0x268   :  { %3468 = vmatprep.subr.bf16.mxu1 %v3863_v3 }
 0x269   :  { %3421 = vmatpush1.bf16.msra.mxu0 %v4302_v6 }
 0x26b   :  { %3470 = vmatpush3.bf16.msra.mxu1 %v4103_v12  ;;  %v1078_v12 = vld [vmem:[%s4915_s1 + $0x38] sm:$0xff] }
 0x26c   :  { %3471 = vmatprep.subr.bf16.mxu1 %v3863_v3 }
 0x26f   :  { %3473 = vmatpush3.bf16.msra.mxu1 %v4115_v17  ;;  %v1081_v17 = vld [vmem:[%s4915_s1 + $0x50] sm:$0xff] }
 0x270   :  { %3506 = vmatprep.subr.bf16.mxu1 %v3863_v3  ;;  %v4312_v32 = vpack.c.bf16 %v1081_v17, %v1078_v12 }
 0x272   :  { %3423 = vmatprep.subr.bf16.mxu0 %v4312_v32 }
 0x273   :  { %3425 = vmatpush1.bf16.msra.mxu0 %v4320_v44 }
 0x274   :  { %3427 = vmatprep.subr.bf16.mxu0 %v4330_v59 }
 0x277   :  { %3429 = vmatpush1.bf16.msra.mxu0 %v4338_v7 }
 0x278   :  { %3431 = vmatprep.subr.bf16.mxu0 %v4351_v18 }
 0x27b   :  { %3433 = vmatpush1.bf16.msra.mxu0 %v4362_v24 }
 0x27c   :  { %3435 = vmatprep.subr.bf16.mxu0 %v4364_v26 }
 0x27f   :  { %3437 = vmatpush1.bf16.msra.mxu0 %v4380_v36 }
 0x280   :  { %3439 = vmatprep.subr.bf16.mxu0 %v4383_v37 }
 0x283   :  { %3441 = vmatpush1.bf16.msra.mxu0 %v4398_v42 }
 0x284   :  { %3443 = vmatprep.subr.bf16.mxu0 %v4401_v45 }
 0x287   :  { %3445 = vmatpush1.bf16.msra.mxu0 %v4416_v51 }
 0x288   :  { %3447 = vmatprep.subr.bf16.mxu0 %v4419_v54 }
 0x28b   :  { %3449 = vmatpush1.bf16.msra.mxu0 %v4428_v57 }
 0x28c   :  { %3475 = vmatprep.subr.bf16.mxu0 %v4294_v43 }
 0x325   :  { %v864_v58 = vpop.f32.mrb[4].mxu0  ;;  %v935_v11 = vpop.f32.mrb[4].mxu1 }
 0x326   :  { %v946_v0 = vrot.slane %v864_v58, %v4156_v25  ;;  %v866_v1 = vpop.f32.mrb[5].mxu0  ;;  %v3074_v9 = vpop.f32.mrb[5].mxu1  ;;  %v1023_v22 = vadd.f32 %v4171_v47, %v935_v11 }
 0x327   :  { %v991_v63 = vrot.slane %v866_v1, %v4156_v25 }
 0x328   :  { %v947_v15 = vcombine.high %v946_v0, %v946_v0  ;;  %v954_v60 = vrot.slane %v946_v0, %v4156_v25  ;;  %v1031_v28 = vrot.slane %v1023_v22, %v4156_v25  ;;  %v1439_v22 = vld [vmem:[%s4915_s1 + $0xe8] sm:$0xff] }
 0x329   :  { %v992_v12 = vcombine.high %v991_v63, %v991_v63  ;;  %v999_v41 = vrot.slane %v991_v63, %v4156_v25 }
 0x32a   :  { %v961_v29 = vrot.slane %v947_v15, %v4156_v25  ;;  %v964_v34 = vadd.f32 %v2797_v10, %v954_v60  ;;  %v1032_v30 = vcombine.high %v1031_v28, %v1031_v28  ;;  %v1039_v39 = vrot.slane %v1031_v28, %v4156_v25  ;;  %v1442_v28 = vld [vmem:[%s4915_s1 + $0x100] sm:$0xff] }
 0x32b   :  { %v1006_v53 = vrot.slane %v992_v12, %v4156_v25  ;;  %v1009_v62 = vadd.f32 %v999_v41, %v980_v35  ;;  %v1412_v12 = vld [vmem:[%s4915_s1 + $0x10] sm:$0xff]  ;;  %v1418_v41 = vld [vmem:[%s4915_s1 + $0x40] sm:$0xff] }
 0x32c   :  { %v965_v52 = vadd.f32 %v2798_v23, %v961_v29  ;;  %v2799_v61 = vmul.f32 -1.442695, %v964_v34  ;;  %v1046_v46 = vrot.slane %v1032_v30, %v4156_v25  ;;  %v1445_v30 = vld [vmem:[%s4915_s1 + $0x118] sm:$0xff] }
 0x32d   :  { %v1010_v2 = vadd.f32 %v1006_v53, %v981_v50  ;;  %v2801_v8 = vmul.f32 -1.442695, %v1009_v62  ;;  %v1421_v50 = vld [vmem:[%s4915_s1 + $0x58] sm:$0xff]  ;;  %v1424_v62 = vld [vmem:[%s4915_s1 + $0x70] sm:$0xff] }
 0x32e   :  { %3742 = vpow2.f32 %v2799_v61  ;;  %v2800_v17 = vmul.f32 -1.442695, %v965_v52  ;;  %v4502_v53 = vpack.c.bf16 %v1421_v50, %v1418_v41 }
 0x32f   :  { %v2802_v14 = vmul.f32 -1.442695, %v1010_v2  ;;  %v1427_v2 = vld [vmem:[%s4915_s1 + $0x88] sm:$0xff] }
 0x330   :  { %3744 = vpow2.f32 %v2800_v17  ;;  %v1415_v17 = vld [vmem:[%s4915_s1 + $0x28] sm:$0xff] }
 0x331   :  { %3746 = vpow2.f32 %v2801_v8  ;;  %v4492_v35 = vpack.c.bf16 %v1415_v17, %v1412_v12  ;;  %v4512_v8 = vpack.c.bf16 %v1427_v2, %v1424_v62 }
 0x338   :  { %v3743_v13 = vpop.eup %3742 }
 0x339   :  { %v972_v19 = vadd.f32 1.0, %v3743_v13  ;;  %v1430_v13 = vld [vmem:[%s4915_s1 + $0xa0] sm:$0xff] }
 0x33a   :  { %v3745_v20 = vpop.eup %3744 }
 0x33b   :  { %v973_v27 = vadd.f32 1.0, %v3745_v20  ;;  %3748 = vrcp.f32 %v972_v19  ;;  %v3747_v31 = vpop.eup %3746  ;;  %v1436_v20 = vld [vmem:[%s4915_s1 + $0xd0] sm:$0xff] }
 0x33c   :  { %3750 = vpow2.f32 %v2802_v14  ;;  %v1017_v55 = vadd.f32 1.0, %v3747_v31  ;;  %v1433_v14 = vld [vmem:[%s4915_s1 + $0xb8] sm:$0xff]  ;;  %v4541_v31 = vpack.c.bf16 %v1445_v30, %v1442_v28 }
 0x33d   :  { %3752 = vrcp.f32 %v973_v27  ;;  %v4522_v19 = vpack.c.bf16 %v1433_v14, %v1430_v13  ;;  %v4531_v27 = vpack.c.bf16 %v1439_v22, %v1436_v20 }
 0x345   :  { %v3749_v40 = vpop.eup %3748 }
 0x346   :  { %v3751_v5 = vpop.eup %3750  ;;  %v1049_v48 = vmul.f32 %v3749_v40, %v1039_v39  ;;  %v1451_v39 = vld [vmem:[%s4915_s1 + $0x148] sm:$0xff] }
 0x347   :  { %v3753_v49 = vpop.eup %3752  ;;  %v1018_v0 = vadd.f32 1.0, %v3751_v5  ;;  %v1454_v5 = vld [vmem:[%s4915_s1 + $0x160] sm:$0xff] }
 0x348   :  { %v1050_v56 = vmul.f32 %v3753_v49, %v1046_v46  ;;  %v1055_v58 = vadd.f32 %v1051_v38, %v1049_v48  ;;  %v1448_v38 = vld [vmem:[%s4915_s1 + $0x130] sm:$0xff] }
 0x349   :  { %v4551_v40 = vpack.c.bf16 %v1451_v39, %v1448_v38 }
 0x34a   :  { %v1056_v11 = vadd.f32 %v1052_v33, %v1050_v56  ;;  %3754 = vtanh.f32 %v1055_v58  ;;  %v1457_v33 = vld [vmem:[%s4915_s1 + $0x178] sm:$0xff] }
 0x34b   :  { %3756 = vrcp.f32 %v1017_v55  ;;  %v4561_v46 = vpack.c.bf16 %v1457_v33, %v1454_v5 }
 0x34c   :  { %3758 = vtanh.f32 %v1056_v11  ;;  %v2803_v11 = vld [vmem:[%s4916_s0 + $0x3] ss:$8 sm:$0x7] }
 0x34d   :  { %3760 = vrcp.f32 %v1018_v0  ;;  %v1390_v5 = vrot.slane %v2803_v11, 2 }
 0x354   :  { %v3755_v1 = vpop.eup %3754 }
 0x355   :  { %v3757_v9 = vpop.eup %3756  ;;  %v1059_v10 = vsub.f32 %v4253_v16, %v3755_v1 }
 0x356   :  { %v3759_v15 = vpop.eup %3758 }
 0x357   :  { %v1060_v60 = vsub.f32 %v4255_v21, %v3759_v15  ;;  %v1061_v63 = vmul.f32 %v3757_v9, %v1059_v10  ;;  %v3761_v23 = vpop.eup %3760  ;;  %v2804_v10 = vld [vmem:[%s4916_s0 + $0x1b] ss:$8 sm:$0x7] }
 0x358   :  { %v1320_v12 = vrot.slane %v2804_v10, 1 }
 0x359   :  { %v1062_v29 = vmul.f32 %v3761_v23, %v1060_v60  ;;  %v4451_v34 = vadd.f32 %v3755_v1, %v1061_v63 }
 0x35b   :  { %v4453_v52 = vadd.f32 %v3759_v15, %v1062_v29  ;;  %1065 = vst [vmem:[%s4918_s3 + $0x2] sm:$0x1] %v4451_v34 }
 0x35d   :  { %1066 = vst [vmem:[%s4918_s3 + $0xa] sm:$0x1] %v4453_v52  ;;  %v1121_v16 = vcombine.low %v4451_v34, %v4453_v52 }
 0x35f   :  { %v1128_v21 = vrot.slane %v1121_v16, %v4156_v25 }
 0x361   :  { %v1135_v61 = vrot.slane %v1128_v21, %v4156_v25  ;;  %v1319_v21 = vrot.slane %v2803_v11, 1 }
 0x363   :  { %1202 = vmatmul.mubr.f32.vlgmr.msra.gmra.mrb[6].mxu0 %v1135_v61  ;;  %3108 = vmatmul.mubr.f32.vlgmr.msra.gmra.mrb[6].mxu1 %v1135_v61 }
 0x364   :  { %3477 = vmatpush1.bf16.msra.mxu0 %v4302_v6  ;;  %1540 = vmatprep.mubr.f32.mxu0 %v3864_v4 }
 0x365   :  { %3479 = vmatprep.subr.bf16.mxu0 %v4312_v32  ;;  %3142 = vmatprep.mubr.msk.f32.mxu1 %vm3865_vm0, %v3864_v4 }
 0x366   :  { %3508 = vmatpush3.bf16.msra.mxu1 %v4492_v35 }
 0x367   :  { %3509 = vmatprep.subr.bf16.mxu1 %v3863_v3 }
 0x368   :  { %3481 = vmatpush1.bf16.msra.mxu0 %v4320_v44 }
 0x369   :  { %3483 = vmatprep.subr.bf16.mxu0 %v4330_v59 }
 0x36a   :  { %3511 = vmatpush3.bf16.msra.mxu1 %v4502_v53 }
 0x36b   :  { %3512 = vmatprep.subr.bf16.mxu1 %v3863_v3 }
 0x36c   :  { %3485 = vmatpush1.bf16.msra.mxu0 %v4338_v7 }
 0x36d   :  { %3487 = vmatprep.subr.bf16.mxu0 %v4351_v18 }
 0x36e   :  { %3514 = vmatpush3.bf16.msra.mxu1 %v4512_v8 }
 0x36f   :  { %3515 = vmatprep.subr.bf16.mxu1 %v3863_v3 }
 0x370   :  { %3489 = vmatpush1.bf16.msra.mxu0 %v4362_v24 }
 0x371   :  { %3491 = vmatprep.subr.bf16.mxu0 %v4364_v26 }
 0x372   :  { %3517 = vmatpush3.bf16.msra.mxu1 %v4522_v19 }
 0x373   :  { %3518 = vmatprep.subr.bf16.mxu1 %v3863_v3 }
 0x374   :  { %3493 = vmatpush1.bf16.msra.mxu0 %v4380_v36 }
 0x375   :  { %3495 = vmatprep.subr.bf16.mxu0 %v4383_v37 }
 0x376   :  { %3520 = vmatpush3.bf16.msra.mxu1 %v4531_v27 }
 0x377   :  { %3521 = vmatprep.subr.bf16.mxu1 %v3863_v3 }
 0x378   :  { %3497 = vmatpush1.bf16.msra.mxu0 %v4398_v42 }
 0x379   :  { %3499 = vmatprep.subr.bf16.mxu0 %v4401_v45 }
 0x37a   :  { %3523 = vmatpush3.bf16.msra.mxu1 %v4541_v31 }
 0x37b   :  { %3524 = vmatprep.subr.bf16.mxu1 %v3863_v3 }
 0x37c   :  { %3501 = vmatpush1.bf16.msra.mxu0 %v4416_v51 }
 0x37d   :  { %3503 = vmatprep.subr.bf16.mxu0 %v4419_v54 }
 0x37e   :  { %3526 = vmatpush3.bf16.msra.mxu1 %v4551_v40 }
 0x37f   :  { %3527 = vmatprep.subr.bf16.mxu1 %v3863_v3 }
 0x380   :  { %3505 = vmatpush1.bf16.msra.mxu0 %v4428_v57 }
 0x381   :  { %3531 = vmatprep.subr.bf16.mxu0 %v4294_v43 }
 0x382   :  { %3529 = vmatpush3.bf16.msra.mxu1 %v4561_v46 }
 0x383   :  { %3562 = vmatprep.subr.bf16.mxu1 %v3863_v3 }
 0x436   :  { %v1203_v48 = vpop.f32.mrb[6].mxu0  ;;  %v1274_v49 = vpop.f32.mrb[6].mxu1 }
 0x437   :  { %v1285_v55 = vrot.slane %v1203_v48, %v4156_v25  ;;  %v1205_v56 = vpop.f32.mrb[7].mxu0  ;;  %v3109_v58 = vpop.f32.mrb[7].mxu1  ;;  %v1362_v22 = vadd.f32 %v4171_v47, %v1274_v49 }
 0x438   :  { %v1330_v9 = vrot.slane %v1205_v56, %v4156_v25  ;;  %v1391_v56 = vrot.slane %v2804_v10, 2 }
 0x439   :  { %v1286_v0 = vcombine.high %v1285_v55, %v1285_v55  ;;  %v1293_v1 = vrot.slane %v1285_v55, %v4156_v25  ;;  %v1370_v30 = vrot.slane %v1362_v22, %v4156_v25 }
 0x43a   :  { %v1331_v29 = vcombine.high %v1330_v9, %v1330_v9  ;;  %v1338_v61 = vrot.slane %v1330_v9, %v4156_v25 }
 0x43b   :  { %v1300_v15 = vrot.slane %v1286_v0, %v4156_v25  ;;  %v1303_v60 = vadd.f32 %v2803_v11, %v1293_v1  ;;  %v1371_v38 = vcombine.high %v1370_v30, %v1370_v30  ;;  %v1378_v33 = vrot.slane %v1370_v30, %v4156_v25 }
 0x43c   :  { %v1345_v17 = vrot.slane %v1331_v29, %v4156_v25  ;;  %v1348_v41 = vadd.f32 %v1338_v61, %v1319_v21 }
 0x43d   :  { %v1304_v63 = vadd.f32 %v2804_v10, %v1300_v15  ;;  %v2805_v23 = vmul.f32 -1.442695, %v1303_v60  ;;  %v1385_v58 = vrot.slane %v1371_v38, %v4156_v25 }
 0x43e   :  { %v1349_v50 = vadd.f32 %v1345_v17, %v1320_v12  ;;  %v2807_v62 = vmul.f32 -1.442695, %v1348_v41 }
 0x43f   :  { %3762 = vpow2.f32 %v2805_v23  ;;  %v2806_v16 = vmul.f32 -1.442695, %v1304_v63 }
 0x440   :  { %v2808_v13 = vmul.f32 -1.442695, %v1349_v50 }
 0x441   :  { %3764 = vpow2.f32 %v2806_v16 }
 0x442   :  { %3766 = vpow2.f32 %v2807_v62 }
 0x449   :  { %v3763_v2 = vpop.eup %3762 }
 0x44a   :  { %v1311_v14 = vadd.f32 1.0, %v3763_v2 }
 0x44b   :  { %v3765_v20 = vpop.eup %3764 }
 0x44c   :  { %v1312_v28 = vadd.f32 1.0, %v3765_v20  ;;  %3768 = vrcp.f32 %v1311_v14  ;;  %v3767_v39 = vpop.eup %3766  ;;  %v2809_v20 = vld [vmem:[%s4916_s0 + $0x4] ss:$8 sm:$0x7] }
 0x44d   :  { %3770 = vpow2.f32 %v2808_v13  ;;  %v1356_v47 = vadd.f32 1.0, %v3767_v39 }
 0x44e   :  { %3772 = vrcp.f32 %v1312_v28 }
 0x456   :  { %v3769_v48 = vpop.eup %3768 }
 0x457   :  { %v3771_v55 = vpop.eup %3770  ;;  %v1388_v0 = vmul.f32 %v3769_v48, %v1378_v33 }
 0x458   :  { %v3773_v1 = vpop.eup %3772  ;;  %v1357_v60 = vadd.f32 1.0, %v3771_v55 }
 0x459   :  { %v1389_v49 = vmul.f32 %v3773_v1, %v1385_v58  ;;  %v1394_v9 = vadd.f32 %v1390_v5, %v1388_v0 }
 0x45b   :  { %v1395_v15 = vadd.f32 %v1391_v56, %v1389_v49  ;;  %3774 = vtanh.f32 %v1394_v9  ;;  %v1658_v56 = vrot.slane %v2809_v20, 1 }
 0x45c   :  { %3776 = vrcp.f32 %v1356_v47 }
 0x45d   :  { %3778 = vtanh.f32 %v1395_v15 }
 0x45e   :  { %3780 = vrcp.f32 %v1357_v60 }
 0x465   :  { %v3775_v63 = vpop.eup %3774 }
 0x466   :  { %v3777_v11 = vpop.eup %3776  ;;  %v1398_v23 = vsub.f32 %v4451_v34, %v3775_v63 }
 0x467   :  { %v3779_v29 = vpop.eup %3778 }
 0x468   :  { %v1399_v10 = vsub.f32 %v4453_v52, %v3779_v29  ;;  %v1400_v16 = vmul.f32 %v3777_v11, %v1398_v23  ;;  %v3781_v21 = vpop.eup %3780  ;;  %v4650_v23 = vld [vmem:[%s4917_s2] ss:$0 sm:$0xff] }
 0x46a   :  { %v1401_v61 = vmul.f32 %v3781_v21, %v1399_v10  ;;  %v4584_v12 = vadd.f32 %v3775_v63, %v1400_v16 }
 0x46c   :  { %v4586_v17 = vadd.f32 %v3779_v29, %v1401_v61  ;;  %1404 = vst [vmem:[%s4918_s3 + $0x3] sm:$0x1] %v4584_v12 }
 0x46e   :  { %1405 = vst [vmem:[%s4918_s3 + $0xb] sm:$0x1] %v4586_v17  ;;  %v1460_v34 = vcombine.low %v4584_v12, %v4586_v17 }
 0x470   :  { %v1467_v52 = vrot.slane %v1460_v34, %v4156_v25  ;;  %v1729_v34 = vrot.slane %v2809_v20, 2 }
 0x472   :  { %v1474_v41 = vrot.slane %v1467_v52, %v4156_v25 }
 0x474   :  { %1541 = vmatmul.mubr.f32.vlgmr.msra.gmra.mrb[8].mxu0 %v1474_v41  ;;  %3143 = vmatmul.mubr.f32.vlgmr.msra.gmra.mrb[8].mxu1 %v1474_v41 }
 0x475   :  { %3533 = vmatpush1.bf16.msra.mxu0 %v4302_v6  ;;  %3564 = vmatpush3.bf16.msra.mxu1 %v4492_v35 }
 0x476   :  { %3535 = vmatprep.subr.bf16.mxu0 %v4312_v32  ;;  %3565 = vmatprep.subr.bf16.mxu1 %v3863_v3 }
 0x477   :  { %1879 = vmatprep.mubr.f32.mxu0 %v3864_v4  ;;  %3177 = vmatprep.mubr.msk.f32.mxu1 %vm3865_vm0, %v3864_v4 }
 0x479   :  { %3537 = vmatpush1.bf16.msra.mxu0 %v4320_v44  ;;  %3567 = vmatpush3.bf16.msra.mxu1 %v4502_v53 }
 0x47a   :  { %3539 = vmatprep.subr.bf16.mxu0 %v4330_v59  ;;  %3568 = vmatprep.subr.bf16.mxu1 %v3863_v3 }
 0x47d   :  { %3541 = vmatpush1.bf16.msra.mxu0 %v4338_v7  ;;  %3570 = vmatpush3.bf16.msra.mxu1 %v4512_v8 }
 0x47e   :  { %3543 = vmatprep.subr.bf16.mxu0 %v4351_v18  ;;  %3571 = vmatprep.subr.bf16.mxu1 %v3863_v3 }
 0x481   :  { %3545 = vmatpush1.bf16.msra.mxu0 %v4362_v24  ;;  %3573 = vmatpush3.bf16.msra.mxu1 %v4522_v19 }
 0x482   :  { %3547 = vmatprep.subr.bf16.mxu0 %v4364_v26  ;;  %3574 = vmatprep.subr.bf16.mxu1 %v3863_v3 }
 0x485   :  { %3549 = vmatpush1.bf16.msra.mxu0 %v4380_v36  ;;  %3576 = vmatpush3.bf16.msra.mxu1 %v4531_v27 }
 0x486   :  { %3551 = vmatprep.subr.bf16.mxu0 %v4383_v37  ;;  %3577 = vmatprep.subr.bf16.mxu1 %v3863_v3 }
 0x489   :  { %3553 = vmatpush1.bf16.msra.mxu0 %v4398_v42  ;;  %3579 = vmatpush3.bf16.msra.mxu1 %v4541_v31 }
 0x48a   :  { %3555 = vmatprep.subr.bf16.mxu0 %v4401_v45  ;;  %3580 = vmatprep.subr.bf16.mxu1 %v3863_v3 }
 0x48d   :  { %3557 = vmatpush1.bf16.msra.mxu0 %v4416_v51  ;;  %3582 = vmatpush3.bf16.msra.mxu1 %v4551_v40 }
 0x48e   :  { %3559 = vmatprep.subr.bf16.mxu0 %v4419_v54  ;;  %3583 = vmatprep.subr.bf16.mxu1 %v3863_v3 }
 0x491   :  { %3561 = vmatpush1.bf16.msra.mxu0 %v4428_v57  ;;  %3585 = vmatpush3.bf16.msra.mxu1 %v4561_v46 }
 0x492   :  { %3587 = vmatprep.subr.bf16.mxu0 %v4294_v43  ;;  %3618 = vmatprep.subr.bf16.mxu1 %v3863_v3  ;;  %v2810_v43 = vld [vmem:[%s4916_s0 + $0x1c] ss:$8 sm:$0x7] }
 0x493   :  { %v1659_v0 = vrot.slane %v2810_v43, 1 }
 0x547   :  { %v1542_v50 = vpop.f32.mrb[8].mxu0  ;;  %v1613_v62 = vpop.f32.mrb[8].mxu1 }
 0x548   :  { %v1624_v2 = vrot.slane %v1542_v50, %v4156_v25  ;;  %v1544_v13 = vpop.f32.mrb[9].mxu0  ;;  %v3144_v14 = vpop.f32.mrb[9].mxu1  ;;  %v1701_v29 = vadd.f32 %v4650_v23, %v1613_v62 }
 0x549   :  { %v1669_v30 = vrot.slane %v1544_v13, %v4156_v25 }
 0x54a   :  { %v1625_v22 = vcombine.high %v1624_v2, %v1624_v2  ;;  %v1632_v28 = vrot.slane %v1624_v2, %v4156_v25  ;;  %v1709_v16 = vrot.slane %v1701_v29, %v4156_v25  ;;  %v1730_v2 = vrot.slane %v2810_v43, 2 }
 0x54b   :  { %v1670_v48 = vcombine.high %v1669_v30, %v1669_v30  ;;  %v1677_v58 = vrot.slane %v1669_v30, %v4156_v25 }
 0x54c   :  { %v1639_v38 = vrot.slane %v1625_v22, %v4156_v25  ;;  %v1642_v39 = vadd.f32 %v2809_v20, %v1632_v28  ;;  %v1710_v21 = vcombine.high %v1709_v16, %v1709_v16  ;;  %v1717_v52 = vrot.slane %v1709_v16, %v4156_v25 }
 0x54d   :  { %v1684_v1 = vrot.slane %v1670_v48, %v4156_v25  ;;  %v1687_v47 = vadd.f32 %v1677_v58, %v1658_v56 }
 0x54e   :  { %v1643_v5 = vadd.f32 %v2810_v43, %v1639_v38  ;;  %v2811_v33 = vmul.f32 -1.442695, %v1642_v39  ;;  %v1724_v13 = vrot.slane %v1710_v21, %v4156_v25 }
 0x54f   :  { %v1688_v49 = vadd.f32 %v1684_v1, %v1659_v0  ;;  %v2813_v9 = vmul.f32 -1.442695, %v1687_v47 }
 0x550   :  { %3782 = vpow2.f32 %v2811_v33  ;;  %v2812_v55 = vmul.f32 -1.442695, %v1643_v5 }
 0x551   :  { %v2814_v60 = vmul.f32 -1.442695, %v1688_v49 }
 0x552   :  { %3784 = vpow2.f32 %v2812_v55 }
 0x553   :  { %3786 = vpow2.f32 %v2813_v9 }
 0x55a   :  { %v3783_v15 = vpop.eup %3782 }
 0x55b   :  { %v1650_v63 = vadd.f32 1.0, %v3783_v15 }
 0x55c   :  { %v3785_v11 = vpop.eup %3784 }
 0x55d   :  { %v1651_v10 = vadd.f32 1.0, %v3785_v11  ;;  %3788 = vrcp.f32 %v1650_v63  ;;  %v3787_v61 = vpop.eup %3786 }
 0x55e   :  { %3790 = vpow2.f32 %v2814_v60  ;;  %v1695_v62 = vadd.f32 1.0, %v3787_v61 }
 0x55f   :  { %3792 = vrcp.f32 %v1651_v10 }
 0x567   :  { %v3789_v41 = vpop.eup %3788 }
 0x568   :  { %v3791_v50 = vpop.eup %3790  ;;  %v1727_v14 = vmul.f32 %v3789_v41, %v1717_v52 }
 0x569   :  { %v3793_v22 = vpop.eup %3792  ;;  %v1696_v39 = vadd.f32 1.0, %v3791_v50 }
 0x56a   :  { %v1728_v28 = vmul.f32 %v3793_v22, %v1724_v13  ;;  %v1733_v30 = vadd.f32 %v1729_v34, %v1727_v14 }
 0x56c   :  { %v1734_v38 = vadd.f32 %v1730_v2, %v1728_v28  ;;  %3794 = vtanh.f32 %v1733_v30 }
 0x56d   :  { %3796 = vrcp.f32 %v1695_v62 }
 0x56e   :  { %3798 = vtanh.f32 %v1734_v38 }
 0x56f   :  { %3800 = vrcp.f32 %v1696_v39 }
 0x576   :  { %v3795_v5 = vpop.eup %3794 }
 0x577   :  { %v3797_v20 = vpop.eup %3796  ;;  %v1737_v33 = vsub.f32 %v4584_v12, %v3795_v5 }
 0x578   :  { %v3799_v48 = vpop.eup %3798 }
 0x579   :  { %v1738_v43 = vsub.f32 %v4586_v17, %v3799_v48  ;;  %v1739_v55 = vmul.f32 %v3797_v20, %v1737_v33  ;;  %v3801_v56 = vpop.eup %3800 }
 0x57b   :  { %v1740_v58 = vmul.f32 %v3801_v56, %v1738_v43  ;;  %v4658_v0 = vadd.f32 %v3795_v5, %v1739_v55 }
 0x57d   :  { %v4660_v1 = vadd.f32 %v3799_v48, %v1740_v58  ;;  %1743 = vst [vmem:[%s4918_s3 + $0x4] sm:$0x1] %v4658_v0 }
 0x57f   :  { %1744 = vst [vmem:[%s4918_s3 + $0xc] sm:$0x1] %v4660_v1  ;;  %v1799_v12 = vcombine.low %v4658_v0, %v4660_v1 }
 0x581   :  { %v1806_v17 = vrot.slane %v1799_v12, %v4156_v25 }
 0x583   :  { %v1813_v47 = vrot.slane %v1806_v17, %v4156_v25 }
 0x585   :  { %1880 = vmatmul.mubr.f32.vlgmr.msra.gmra.mrb[10].mxu0 %v1813_v47  ;;  %3178 = vmatmul.mubr.f32.vlgmr.msra.gmra.mrb[10].mxu1 %v1813_v47 }
 0x586   :  { %3589 = vmatpush1.bf16.msra.mxu0 %v4302_v6  ;;  %3620 = vmatpush3.bf16.msra.mxu1 %v4492_v35 }
 0x587   :  { %3591 = vmatprep.subr.bf16.mxu0 %v4312_v32  ;;  %3621 = vmatprep.subr.bf16.mxu1 %v3863_v3 }
 0x588   :  { %2218 = vmatprep.mubr.f32.mxu0 %v3864_v4  ;;  %3212 = vmatprep.mubr.msk.f32.mxu1 %vm3865_vm0, %v3864_v4 }
 0x58a   :  { %3593 = vmatpush1.bf16.msra.mxu0 %v4320_v44  ;;  %3623 = vmatpush3.bf16.msra.mxu1 %v4502_v53 }
 0x58b   :  { %3595 = vmatprep.subr.bf16.mxu0 %v4330_v59  ;;  %3624 = vmatprep.subr.bf16.mxu1 %v3863_v3 }
 0x58e   :  { %3597 = vmatpush1.bf16.msra.mxu0 %v4338_v7  ;;  %3626 = vmatpush3.bf16.msra.mxu1 %v4512_v8 }
 0x58f   :  { %3599 = vmatprep.subr.bf16.mxu0 %v4351_v18  ;;  %3627 = vmatprep.subr.bf16.mxu1 %v3863_v3  ;;  %v2815_v18 = vld [vmem:[%s4916_s0 + $0x5] ss:$8 sm:$0x7] }
 0x590   :  { %v1997_v9 = vrot.slane %v2815_v18, 1  ;;  %v2068_v14 = vrot.slane %v2815_v18, 2 }
 0x592   :  { %3601 = vmatpush1.bf16.msra.mxu0 %v4362_v24  ;;  %3629 = vmatpush3.bf16.msra.mxu1 %v4522_v19 }
 0x593   :  { %3603 = vmatprep.subr.bf16.mxu0 %v4364_v26  ;;  %3630 = vmatprep.subr.bf16.mxu1 %v3863_v3 }
 0x596   :  { %3605 = vmatpush1.bf16.msra.mxu0 %v4380_v36  ;;  %3632 = vmatpush3.bf16.msra.mxu1 %v4531_v27 }
 0x597   :  { %3607 = vmatprep.subr.bf16.mxu0 %v4383_v37  ;;  %3633 = vmatprep.subr.bf16.mxu1 %v3863_v3  ;;  %v2816_v37 = vld [vmem:[%s4916_s0 + $0x1d] ss:$8 sm:$0x7] }
 0x598   :  { %v1998_v60 = vrot.slane %v2816_v37, 1  ;;  %v2069_v30 = vrot.slane %v2816_v37, 2 }
 0x59a   :  { %3609 = vmatpush1.bf16.msra.mxu0 %v4398_v42  ;;  %3635 = vmatpush3.bf16.msra.mxu1 %v4541_v31 }
 0x59b   :  { %3611 = vmatprep.subr.bf16.mxu0 %v4401_v45  ;;  %3636 = vmatprep.subr.bf16.mxu1 %v3863_v3 }
 0x59e   :  { %3613 = vmatpush1.bf16.msra.mxu0 %v4416_v51  ;;  %3638 = vmatpush3.bf16.msra.mxu1 %v4551_v40 }
 0x59f   :  { %3615 = vmatprep.subr.bf16.mxu0 %v4419_v54  ;;  %3639 = vmatprep.subr.bf16.mxu1 %v3863_v3 }
 0x5a2   :  { %3617 = vmatpush1.bf16.msra.mxu0 %v4428_v57  ;;  %3641 = vmatpush3.bf16.msra.mxu1 %v4561_v46 }
 0x5a3   :  { %3674 = vmatprep.subr.bf16.mxu1 %v3863_v3 }
 0x658   :  { %v1881_v6 = vpop.f32.mrb[10].mxu0  ;;  %v1952_v32 = vpop.f32.mrb[10].mxu1 }
 0x659   :  { %v1963_v44 = vrot.slane %v1881_v6, %v4156_v25  ;;  %v1883_v59 = vpop.f32.mrb[11].mxu0  ;;  %v3179_v7 = vpop.f32.mrb[11].mxu1  ;;  %v2040_v52 = vadd.f32 %v4650_v23, %v1952_v32 }
 0x65a   :  { %v2008_v36 = vrot.slane %v1883_v59, %v4156_v25 }
 0x65b   :  { %v1964_v24 = vcombine.high %v1963_v44, %v1963_v44  ;;  %v1971_v26 = vrot.slane %v1963_v44, %v4156_v25  ;;  %v2048_v50 = vrot.slane %v2040_v52, %v4156_v25 }
 0x65c   :  { %v2009_v57 = vcombine.high %v2008_v36, %v2008_v36  ;;  %v2016_v15 = vrot.slane %v2008_v36, %v4156_v25  ;;  %v2440_v36 = vld [vmem:[%s4915_s1 + $0x68] sm:$0xff] }
 0x65d   :  { %v1978_v42 = vrot.slane %v1964_v24, %v4156_v25  ;;  %v1981_v45 = vadd.f32 %v2815_v18, %v1971_v26  ;;  %v2049_v2 = vcombine.high %v2048_v50, %v2048_v50  ;;  %v2056_v22 = vrot.slane %v2048_v50, %v4156_v25  ;;  %v2436_v24 = vld [vmem:[%s4915_s1 + $0x48] sm:$0xff]  ;;  %v2457_v50 = vld [vmem:[%s4915_s1 + $0xf0] sm:$0xff] }
 0x65e   :  { %v2023_v63 = vrot.slane %v2009_v57, %v4156_v25  ;;  %v2026_v11 = vadd.f32 %v2016_v15, %v1997_v9  ;;  %v2446_v57 = vld [vmem:[%s4915_s1 + $0x98] sm:$0xff]  ;;  %v2445_v9 = vld [vmem:[%s4915_s1 + $0x90] sm:$0xff] }
 0x65f   :  { %v1982_v51 = vadd.f32 %v2816_v37, %v1978_v42  ;;  %v2817_v54 = vmul.f32 -1.442695, %v1981_v45  ;;  %v2063_v38 = vrot.slane %v2049_v2, %v4156_v25  ;;  %v2443_v37 = vld [vmem:[%s4915_s1 + $0x80] sm:$0xff]  ;;  %v2460_v2 = vld [vmem:[%s4915_s1 + $0x108] sm:$0xff] }
 0x660   :  { %v2027_v29 = vadd.f32 %v2023_v63, %v1998_v60  ;;  %v2819_v10 = vmul.f32 -1.442695, %v2026_v11  ;;  %v3650_v42 = vpack.c.bf16 %v2443_v37, %v2440_v36  ;;  %v2439_v45 = vld [vmem:[%s4915_s1 + $0x60] sm:$0xff]  ;;  %v2448_v60 = vld [vmem:[%s4915_s1 + $0xa8] sm:$0xff] }
 0x661   :  { %3802 = vpow2.f32 %v2817_v54  ;;  %v2818_v49 = vmul.f32 -1.442695, %v1982_v51  ;;  %v2442_v51 = vld [vmem:[%s4915_s1 + $0x78] sm:$0xff]  ;;  %v2452_v63 = vld [vmem:[%s4915_s1 + $0xc8] sm:$0xff]  ;;  %v2455_v11 = vld [vmem:[%s4915_s1 + $0xe0] sm:$0xff] }
 0x662   :  { %v2820_v21 = vmul.f32 -1.442695, %v2027_v29  ;;  %v3652_v54 = vpack.c.bf16 %v2442_v51, %v2439_v45  ;;  %v3656_v29 = vpack.c.bf16 %v2448_v60, %v2445_v9 }
 0x663   :  { %3804 = vpow2.f32 %v2818_v49  ;;  %v2449_v49 = vld [vmem:[%s4915_s1 + $0xb0] sm:$0xff] }
 0x664   :  { %3806 = vpow2.f32 %v2819_v10  ;;  %v3654_v15 = vpack.c.bf16 %v2449_v49, %v2446_v57  ;;  %v3658_v10 = vpack.c.bf16 %v2455_v11, %v2452_v63 }
 0x66b   :  { %v3803_v16 = vpop.eup %3802 }
 0x66c   :  { %v1989_v61 = vadd.f32 1.0, %v3803_v16  ;;  %v2451_v16 = vld [vmem:[%s4915_s1 + $0xc0] sm:$0xff] }
 0x66d   :  { %v3805_v34 = vpop.eup %3804 }
 0x66e   :  { %v1990_v41 = vadd.f32 1.0, %v3805_v34  ;;  %3808 = vrcp.f32 %v1989_v61  ;;  %v3807_v13 = vpop.eup %3806  ;;  %v2458_v61 = vld [vmem:[%s4915_s1 + $0xf8] sm:$0xff]  ;;  %v2461_v34 = vld [vmem:[%s4915_s1 + $0x110] sm:$0xff] }
 0x66f   :  { %3810 = vpow2.f32 %v2820_v21  ;;  %v2034_v20 = vadd.f32 1.0, %v3807_v13  ;;  %v2454_v21 = vld [vmem:[%s4915_s1 + $0xd8] sm:$0xff]  ;;  %v2464_v13 = vld [vmem:[%s4915_s1 + $0x128] sm:$0xff] }
 0x670   :  { %3812 = vrcp.f32 %v1990_v41  ;;  %v3660_v52 = vpack.c.bf16 %v2454_v21, %v2451_v16  ;;  %v3662_v41 = vpack.c.bf16 %v2461_v34, %v2458_v61 }
 0x678   :  { %v3809_v62 = vpop.eup %3808 }
 0x679   :  { %v3811_v28 = vpop.eup %3810  ;;  %v2066_v39 = vmul.f32 %v3809_v62, %v2056_v22  ;;  %v3664_v22 = vpack.c.bf16 %v2460_v2, %v2457_v50 }
 0x67a   :  { %v3813_v5 = vpop.eup %3812  ;;  %v2035_v55 = vadd.f32 1.0, %v3811_v28  ;;  %v2463_v28 = vld [vmem:[%s4915_s1 + $0x120] sm:$0xff] }
 0x67b   :  { %v2067_v33 = vmul.f32 %v3813_v5, %v2063_v38  ;;  %v2072_v48 = vadd.f32 %v2068_v14, %v2066_v39  ;;  %v2467_v14 = vld [vmem:[%s4915_s1 + $0x140] sm:$0xff]  ;;  %v2470_v38 = vld [vmem:[%s4915_s1 + $0x158] sm:$0xff]  ;;  %v2473_v39 = vld [vmem:[%s4915_s1 + $0x170] sm:$0xff] }
 0x67c   :  { %v3666_v62 = vpack.c.bf16 %v2467_v14, %v2464_v13 }
 0x67d   :  { %v2073_v43 = vadd.f32 %v2069_v30, %v2067_v33  ;;  %3814 = vtanh.f32 %v2072_v48  ;;  %v2466_v30 = vld [vmem:[%s4915_s1 + $0x138] sm:$0xff]  ;;  %v2469_v33 = vld [vmem:[%s4915_s1 + $0x150] sm:$0xff]  ;;  %v2472_v48 = vld [vmem:[%s4915_s1 + $0x168] sm:$0xff] }
 0x67e   :  { %3816 = vrcp.f32 %v2034_v20  ;;  %v3668_v5 = vpack.c.bf16 %v2466_v30, %v2463_v28  ;;  %v3670_v20 = vpack.c.bf16 %v2473_v39, %v2470_v38 }
 0x67f   :  { %3818 = vtanh.f32 %v2073_v43  ;;  %v3672_v43 = vpack.c.bf16 %v2472_v48, %v2469_v33 }
 0x680   :  { %3820 = vrcp.f32 %v2035_v55 }
 0x687   :  { %v3815_v56 = vpop.eup %3814 }
 0x688   :  { %v3817_v58 = vpop.eup %3816  ;;  %v2076_v12 = vsub.f32 %v4658_v0, %v3815_v56 }
 0x689   :  { %v3819_v17 = vpop.eup %3818 }
 0x68a   :  { %v2077_v47 = vsub.f32 %v4660_v1, %v3819_v17  ;;  %v2078_v6 = vmul.f32 %v3817_v58, %v2076_v12  ;;  %v3821_v32 = vpop.eup %3820 }
 0x68c   :  { %v2079_v44 = vmul.f32 %v3821_v32, %v2077_v47  ;;  %v4726_v59 = vadd.f32 %v3815_v56, %v2078_v6  ;;  %v2821_v47 = vld [vmem:[%s4916_s0 + $0x6] ss:$8 sm:$0x7] }
 0x68d   :  { %v2407_v9 = vrot.slane %v2821_v47, 2 }
 0x68e   :  { %v4728_v7 = vadd.f32 %v3819_v17, %v2079_v44  ;;  %2082 = vst [vmem:[%s4918_s3 + $0x5] sm:$0x1] %v4726_v59 }
 0x690   :  { %2083 = vst [vmem:[%s4918_s3 + $0xd] sm:$0x1] %v4728_v7  ;;  %v2138_v0 = vcombine.low %v4726_v59, %v4728_v7 }
 0x692   :  { %v2145_v1 = vrot.slane %v2138_v0, %v4156_v25  ;;  %v2822_v0 = vld [vmem:[%s4916_s0 + $0x1e] ss:$8 sm:$0x7] }
 0x693   :  { %v2408_v11 = vrot.slane %v2822_v0, 2 }
 0x694   :  { %v2152_v18 = vrot.slane %v2145_v1, %v4156_v25 }
 0x696   :  { %2219 = vmatmul.mubr.f32.vlgmr.msra.gmra.mrb[12].mxu0 %v2152_v18  ;;  %3213 = vmatmul.mubr.f32.vlgmr.msra.gmra.mrb[12].mxu1 %v2152_v18 }
 0x697   :  { %3676 = vmatpush3.bf16.msra.mxu1 %v4492_v35  ;;  %2557 = vmatprep.mubr.f32.mxu0 %v3864_v4  ;;  %v2431_v35 = vld [vmem:[%s4915_s1 + $0x20] sm:$0xff] }
 0x698   :  { %3677 = vmatprep.subr.bf16.mxu1 %v3863_v3  ;;  %3247 = vmatprep.mubr.msk.f32.mxu1 %vm3865_vm0, %v3864_v4  ;;  %v2428_v4 = vld [vmem:[%s4915_s1 + $0x8] sm:$0xff] }
 0x69b   :  { %3679 = vmatpush3.bf16.msra.mxu1 %v4502_v53  ;;  %v3642_v53 = vpack.c.bf16 %v2431_v35, %v2428_v4 }
 0x69c   :  { %3680 = vmatprep.subr.bf16.mxu1 %v3863_v3 }
 0x69d   :  { %3643 = vmatprep.subr.bf16.mxu0 %v3642_v53 }
 0x69f   :  { %3682 = vmatpush3.bf16.msra.mxu1 %v4512_v8  ;;  %v2427_v8 = vld [vmem:[%s4915_s1] sm:$0xff] }
 0x6a0   :  { %3683 = vmatprep.subr.bf16.mxu1 %v3863_v3 }
 0x6a3   :  { %3685 = vmatpush3.bf16.msra.mxu1 %v4522_v19  ;;  %v2430_v19 = vld [vmem:[%s4915_s1 + $0x18] sm:$0xff] }
 0x6a4   :  { %3686 = vmatprep.subr.bf16.mxu1 %v3863_v3 }
 0x6a7   :  { %3688 = vmatpush3.bf16.msra.mxu1 %v4531_v27  ;;  %v2434_v27 = vld [vmem:[%s4915_s1 + $0x38] sm:$0xff] }
 0x6a8   :  { %3689 = vmatprep.subr.bf16.mxu1 %v3863_v3 }
 0x6ab   :  { %3691 = vmatpush3.bf16.msra.mxu1 %v4541_v31  ;;  %v2437_v31 = vld [vmem:[%s4915_s1 + $0x50] sm:$0xff] }
 0x6ac   :  { %3692 = vmatprep.subr.bf16.mxu1 %v3863_v3 }
 0x6af   :  { %3694 = vmatpush3.bf16.msra.mxu1 %v4551_v40  ;;  %v3646_v40 = vpack.c.bf16 %v2437_v31, %v2434_v27  ;;  %v2337_v27 = vrot.slane %v2822_v0, 1 }
 0x6b0   :  { %3695 = vmatprep.subr.bf16.mxu1 %v3863_v3  ;;  %v3644_v3 = vpack.c.bf16 %v2430_v19, %v2427_v8  ;;  %v2336_v19 = vrot.slane %v2821_v47, 1 }
 0x6b2   :  { %3645 = vmatpush1.bf16.msra.mxu0 %v3644_v3 }
 0x6b3   :  { %3697 = vmatpush3.bf16.msra.mxu1 %v4561_v46  ;;  %v2433_v46 = vld [vmem:[%s4915_s1 + $0x30] sm:$0xff]  ;;  %3647 = vmatprep.subr.bf16.mxu0 %v3646_v40 }
 0x6b4   :  { %v3648_v26 = vpack.c.bf16 %v2436_v24, %v2433_v46 }
 0x6b6   :  { %3649 = vmatpush1.bf16.msra.mxu0 %v3648_v26 }
 0x6b7   :  { %3651 = vmatprep.subr.bf16.mxu0 %v3650_v42 }
 0x6ba   :  { %3653 = vmatpush1.bf16.msra.mxu0 %v3652_v54 }
 0x6bb   :  { %3655 = vmatprep.subr.bf16.mxu0 %v3654_v15 }
 0x6be   :  { %3657 = vmatpush1.bf16.msra.mxu0 %v3656_v29 }
 0x6bf   :  { %3659 = vmatprep.subr.bf16.mxu0 %v3658_v10 }
 0x6c2   :  { %3661 = vmatpush1.bf16.msra.mxu0 %v3660_v52 }
 0x6c3   :  { %3663 = vmatprep.subr.bf16.mxu0 %v3662_v41 }
 0x6c6   :  { %3665 = vmatpush1.bf16.msra.mxu0 %v3664_v22 }
 0x6c7   :  { %3667 = vmatprep.subr.bf16.mxu0 %v3666_v62 }
 0x6ca   :  { %3669 = vmatpush1.bf16.msra.mxu0 %v3668_v5 }
 0x6cb   :  { %3671 = vmatprep.subr.bf16.mxu0 %v3670_v20 }
 0x6ce   :  { %3673 = vmatpush1.bf16.msra.mxu0 %v3672_v43 }
 0x769   :  { %v2220_v55 = vpop.f32.mrb[12].mxu0  ;;  %v2291_v56 = vpop.f32.mrb[12].mxu1 }
 0x76a   :  { %v2302_v58 = vrot.slane %v2220_v55, %v4156_v25  ;;  %v2222_v12 = vpop.f32.mrb[13].mxu0  ;;  %v3214_v17 = vpop.f32.mrb[13].mxu1  ;;  %v2379_v45 = vadd.f32 %v4650_v23, %v2291_v56  ;;  %v2827_v56 = vld [vmem:[%s4916_s0 + $0x7] ss:$8 sm:$0x7] }
 0x76b   :  { %v2347_v44 = vrot.slane %v2222_v12, %v4156_v25 }
 0x76c   :  { %v2303_v6 = vcombine.high %v2302_v58, %v2302_v58  ;;  %v2310_v32 = vrot.slane %v2302_v58, %v4156_v25  ;;  %v2387_v54 = vrot.slane %v2379_v45, %v4156_v25 }
 0x76d   :  { %v2348_v53 = vcombine.high %v2347_v44, %v2347_v44  ;;  %v2355_v3 = vrot.slane %v2347_v44, %v4156_v25 }
 0x76e   :  { %v2317_v1 = vrot.slane %v2303_v6, %v4156_v25  ;;  %v2320_v18 = vadd.f32 %v2821_v47, %v2310_v32  ;;  %v2388_v57 = vcombine.high %v2387_v54, %v2387_v54  ;;  %v2395_v15 = vrot.slane %v2387_v54, %v4156_v25  ;;  %v2828_v47 = vld [vmem:[%s4916_s0 + $0x1f] ss:$8 sm:$0x7] }
 0x76f   :  { %v2362_v31 = vrot.slane %v2348_v53, %v4156_v25  ;;  %v2365_v40 = vadd.f32 %v2355_v3, %v2336_v19  ;;  %v2676_v53 = vrot.slane %v2828_v47, 1 }
 0x770   :  { %v2321_v4 = vadd.f32 %v2822_v0, %v2317_v1  ;;  %v2823_v35 = vmul.f32 -1.442695, %v2320_v18  ;;  %v2402_v29 = vrot.slane %v2388_v57, %v4156_v25 }
 0x771   :  { %v2366_v46 = vadd.f32 %v2362_v31, %v2337_v27  ;;  %v2825_v24 = vmul.f32 -1.442695, %v2365_v40 }
 0x772   :  { %3822 = vpow2.f32 %v2823_v35  ;;  %v2824_v8 = vmul.f32 -1.442695, %v2321_v4  ;;  %v2675_v4 = vrot.slane %v2827_v56, 1 }
 0x773   :  { %v2826_v36 = vmul.f32 -1.442695, %v2366_v46 }
 0x774   :  { %3824 = vpow2.f32 %v2824_v8 }
 0x775   :  { %3826 = vpow2.f32 %v2825_v24 }
 0x77c   :  { %v3823_v26 = vpop.eup %3822 }
 0x77d   :  { %v2328_v37 = vadd.f32 1.0, %v3823_v26 }
 0x77e   :  { %v3825_v42 = vpop.eup %3824 }
 0x77f   :  { %v2329_v51 = vadd.f32 1.0, %v3825_v42  ;;  %3828 = vrcp.f32 %v2328_v37  ;;  %v3827_v49 = vpop.eup %3826 }
 0x780   :  { %3830 = vpow2.f32 %v2826_v36  ;;  %v2373_v21 = vadd.f32 1.0, %v3827_v49 }
 0x781   :  { %3832 = vrcp.f32 %v2329_v51  ;;  %v2746_v51 = vrot.slane %v2827_v56, 2 }
 0x789   :  { %v3829_v60 = vpop.eup %3828 }
 0x78a   :  { %v3831_v63 = vpop.eup %3830  ;;  %v2405_v10 = vmul.f32 %v3829_v60, %v2395_v15 }
 0x78b   :  { %v3833_v16 = vpop.eup %3832  ;;  %v2374_v41 = vadd.f32 1.0, %v3831_v63 }
 0x78c   :  { %v2406_v61 = vmul.f32 %v3833_v16, %v2402_v29  ;;  %v2411_v34 = vadd.f32 %v2407_v9, %v2405_v10  ;;  %v2747_v9 = vrot.slane %v2828_v47, 2 }
 0x78e   :  { %v2412_v52 = vadd.f32 %v2408_v11, %v2406_v61  ;;  %3834 = vtanh.f32 %v2411_v34 }
 0x78f   :  { %3836 = vrcp.f32 %v2373_v21 }
 0x790   :  { %3838 = vtanh.f32 %v2412_v52 }
 0x791   :  { %3840 = vrcp.f32 %v2374_v41 }
 0x798   :  { %v3835_v50 = vpop.eup %3834 }
 0x799   :  { %v3837_v2 = vpop.eup %3836  ;;  %v2415_v13 = vsub.f32 %v4726_v59, %v3835_v50 }
 0x79a   :  { %v3839_v14 = vpop.eup %3838 }
 0x79b   :  { %v2416_v22 = vsub.f32 %v4728_v7, %v3839_v14  ;;  %v2417_v62 = vmul.f32 %v3837_v2, %v2415_v13  ;;  %v3841_v28 = vpop.eup %3840 }
 0x79d   :  { %v2418_v30 = vmul.f32 %v3841_v28, %v2416_v22  ;;  %v4874_v38 = vadd.f32 %v3835_v50, %v2417_v62 }
 0x79f   :  { %v4876_v39 = vadd.f32 %v3839_v14, %v2418_v30  ;;  %2421 = vst [vmem:[%s4918_s3 + $0x6] sm:$0x1] %v4874_v38 }
 0x7a1   :  { %2422 = vst [vmem:[%s4918_s3 + $0xe] sm:$0x1] %v4876_v39  ;;  %v2477_v59 = vcombine.low %v4874_v38, %v4876_v39 }
 0x7a3   :  { %v2484_v7 = vrot.slane %v2477_v59, %v4156_v25 }
 0x7a5   :  { %v2491_v5 = vrot.slane %v2484_v7, %v4156_v25 }
 0x7a7   :  { %2558 = vmatmul.mubr.f32.vlgmr.msra.gmra.mrb[14].mxu0 %v2491_v5  ;;  %3248 = vmatmul.mubr.f32.vlgmr.msra.gmra.mrb[14].mxu1 %v2491_v5 }
 0x87a   :  { %v2559_v20 = vpop.f32.mrb[14].mxu0  ;;  %v2630_v33 = vpop.f32.mrb[14].mxu1 }
 0x87b   :  { %v2641_v48 = vrot.slane %v2559_v20, %v4156_v25  ;;  %v2561_v43 = vpop.f32.mrb[15].mxu0  ;;  %v3249_v55 = vpop.f32.mrb[15].mxu1  ;;  %v2718_v26 = vadd.f32 %v4650_v23, %v2630_v33 }
 0x87c   :  { %v2686_v17 = vrot.slane %v2561_v43, %v4156_v25 }
 0x87d   :  { %v2642_v58 = vcombine.high %v2641_v48, %v2641_v48  ;;  %v2649_v12 = vrot.slane %v2641_v48, %v4156_v25  ;;  %v2726_v37 = vrot.slane %v2718_v26, %v4156_v25 }
 0x87e   :  { %v2687_v1 = vcombine.high %v2686_v17, %v2686_v17  ;;  %v2694_v35 = vrot.slane %v2686_v17, %v4156_v25 }
 0x87f   :  { %v2656_v6 = vrot.slane %v2642_v58, %v4156_v25  ;;  %v2659_v32 = vadd.f32 %v2827_v56, %v2649_v12  ;;  %v2727_v42 = vcombine.high %v2726_v37, %v2726_v37  ;;  %v2734_v54 = vrot.slane %v2726_v37, %v4156_v25 }
 0x880   :  { %v2701_v8 = vrot.slane %v2687_v1, %v4156_v25  ;;  %v2704_v19 = vadd.f32 %v2694_v35, %v2675_v4 }
 0x881   :  { %v2660_v44 = vadd.f32 %v2828_v47, %v2656_v6  ;;  %v2829_v0 = vmul.f32 -1.442695, %v2659_v32  ;;  %v2741_v15 = vrot.slane %v2727_v42, %v4156_v25 }
 0x882   :  { %v2705_v3 = vadd.f32 %v2701_v8, %v2676_v53  ;;  %v2831_v27 = vmul.f32 -1.442695, %v2704_v19 }
 0x883   :  { %3842 = vpow2.f32 %v2829_v0  ;;  %v2830_v18 = vmul.f32 -1.442695, %v2660_v44 }
 0x884   :  { %v2832_v40 = vmul.f32 -1.442695, %v2705_v3 }
 0x885   :  { %3844 = vpow2.f32 %v2830_v18 }
 0x886   :  { %3846 = vpow2.f32 %v2831_v27 }
 0x88d   :  { %v3843_v31 = vpop.eup %3842 }
 0x88e   :  { %v2667_v46 = vadd.f32 1.0, %v3843_v31 }
 0x88f   :  { %v3845_v24 = vpop.eup %3844 }
 0x890   :  { %v2668_v36 = vadd.f32 1.0, %v3845_v24  ;;  %3848 = vrcp.f32 %v2667_v46  ;;  %v3847_v45 = vpop.eup %3846 }
 0x891   :  { %3850 = vpow2.f32 %v2832_v40  ;;  %v2712_v23 = vadd.f32 1.0, %v3847_v45 }
 0x892   :  { %3852 = vrcp.f32 %v2668_v36 }
 0x89a   :  { %v3849_v57 = vpop.eup %3848 }
 0x89b   :  { %v3851_v49 = vpop.eup %3850  ;;  %v2744_v60 = vmul.f32 %v3849_v57, %v2734_v54 }
 0x89c   :  { %v3853_v63 = vpop.eup %3852  ;;  %v2713_v16 = vadd.f32 1.0, %v3851_v49 }
 0x89d   :  { %v2745_v11 = vmul.f32 %v3853_v63, %v2741_v15  ;;  %v2750_v29 = vadd.f32 %v2746_v51, %v2744_v60 }
 0x89f   :  { %v2751_v10 = vadd.f32 %v2747_v9, %v2745_v11  ;;  %3854 = vtanh.f32 %v2750_v29 }
 0x8a0   :  { %3856 = vrcp.f32 %v2712_v23 }
 0x8a1   :  { %3858 = vtanh.f32 %v2751_v10 }
 0x8a2   :  { %3860 = vrcp.f32 %v2713_v16 }
 0x8a9   :  { %v3855_v21 = vpop.eup %3854 }
 0x8aa   :  { %v3857_v61 = vpop.eup %3856  ;;  %v2754_v34 = vsub.f32 %v4874_v38, %v3855_v21 }
 0x8ab   :  { %v3859_v52 = vpop.eup %3858 }
 0x8ac   :  { %v2755_v41 = vsub.f32 %v4876_v39, %v3859_v52  ;;  %v2756_v50 = vmul.f32 %v3857_v61, %v2754_v34  ;;  %v3861_v2 = vpop.eup %3860 }
 0x8ae   :  { %v2757_v13 = vmul.f32 %v3861_v2, %v2755_v41  ;;  %v2758_v14 = vadd.f32 %v3855_v21, %v2756_v50 }
 0x8b0   :  { %v2759_v22 = vadd.f32 %v3859_v52, %v2757_v13  ;;  %2760 = vst [vmem:[%s4918_s3 + $0x7] sm:$0x1] %v2758_v14 }
 0x8b2   :  { %2761 = vst [vmem:[%s4918_s3 + $0xf] sm:$0x1] %v2759_v22  ;;  %v2764_v62 = vcombine.low %v2758_v14, %v2759_v22 }
 0x8b4   :  { %v2771_v28 = vrot.slane %v2764_v62, %v4156_v25 }
 0x8b6   :  { %2833 = vst.sshfl [vmem:[#allocation2] sm:$0x5 pattern:$0x73625140] %v2771_v28 }

</bundles_post_ra>
